<compile_context>
chip_gen: v5e
topology: v5e:2x2
jax: 0.10.0
libtpu: 0.0.40
codegen_flags: <defaults>
</compile_context>

<pallas_src>
import functools

import jax
import jax.numpy as jnp
from jax import lax
from jax.experimental import pallas as pl
from jax.experimental.pallas import tpu as pltpu


def _nce_loss_kernel(q_ref, k_ref, out_ref, rsum_ref, pos_ref, *, inv_temp):
    """One (batch, q-tile, kv-tile) grid step.

    q_ref: (1, D, TQ) VMEM tile (channels-major, NCHW-native).
    k_ref: (1, D, TK) VMEM tile.
    out_ref: (1, 1, 128) per-(batch, q-tile) output block; the scalar partial-loss is
             broadcast over 128 lanes (lane-dense unmasked store).
    rsum_ref: (TQ, 1) f32 running rowsum of exp(s - inv_temp) across kv tiles.
    pos_ref:  (1, 1) f32 running sum of the positive logits for this q-tile.
    """
    qi = pl.program_id(1)
    ki = pl.program_id(2)
    nk = pl.num_programs(2)

    @pl.when(ki == 0)
    def _init():
        rsum_ref[...] = jnp.zeros_like(rsum_ref)
        pos_ref[...] = jnp.zeros_like(pos_ref)

    q = q_ref[0].astype(jnp.float32)          # (D, TQ)
    k = k_ref[0].astype(jnp.float32)          # (D, TK)

    # F.normalize(p=1, dim=-1): x / max(||x||_1, 1e-12); reduction over the D (sublane)
    # axis. Exact divides (only D*T elements) -- the error of an approx reciprocal would
    # be amplified by 1/temperature before exp.
    eps = jnp.float32(1e-12)
    q_norm = jnp.maximum(jnp.sum(jnp.abs(q), axis=0, keepdims=True), eps)   # (1, TQ)
    k_norm = jnp.maximum(jnp.sum(jnp.abs(k), axis=0, keepdims=True), eps)   # (1, TK)
    # Fold 1/temperature into qn so neither s nor pos needs an extra NxN / Nx1 scale.
    qn = q * (jnp.float32(inv_temp) / q_norm)                               # (D, TQ)
    kn = k / k_norm                                                         # (D, TK)

    # s[i, j] = sum_d qn[d, i] * kn[d, j] -> (TQ, TK); contraction over D, no relayout.
    s = lax.dot_general(
        qn, kn,
        dimension_numbers=(((0,), (0,)), ((), ())),
        preferred_element_type=jnp.float32,
    )

    # L1-normalized inputs => |s| <= inv_temp, so a compile-time constant shift is a safe
    # replacement for the per-row max: exp(s - inv_temp) in (0, 1]. Single pass over s.
    rsum_ref[...] += jnp.sum(jnp.exp(s - jnp.float32(inv_temp)), axis=-1, keepdims=True)

    # Positive logits are the diagonal of the full s; with TQ == TK the diagonal lives
    # only in the block where the kv-tile index equals the q-tile index.
    @pl.when(ki == qi)
    def _pos():
        pos_ref[...] += jnp.sum(qn * kn)

    @pl.when(ki == nk - 1)
    def _finalize():
        # Guard against underflow for pathologically small user temperatures.
        rsum = jnp.maximum(rsum_ref[...], jnp.float32(1e-30))               # (TQ, 1)
        lse_total = jnp.sum(jnp.float32(inv_temp) + jnp.log(rsum))          # scalar
        total = lse_total - pos_ref[0, 0]
        out_ref[...] = jnp.full(out_ref.shape, total, dtype=jnp.float32)


def _pick_tile(n, max_tile=512):
    """Pick a q/kv tile size that divides N exactly (no ragged-tile masking needed)."""
    if n <= max_tile:
        return n
    for t in (512, 256, 128):
        if n % t == 0:
            return t
    return n  # irregular large N: single full-N block (see TODO at top)


def contrastive_loss_sup(feat_q, feat_k, temperature=0.07, base_temperature=0.07):
    """JAX / Pallas equivalent of the PyTorch contrastive_loss_sup.forward.

    feat_q, feat_k: (B, C, H, W) arrays (NCHW, same as PyTorch).
    Returns a scalar loss (mean cross-entropy over B*N rows).
    """
    del base_temperature  # unused in the reference forward pass
    assert feat_q.shape == feat_k.shape, (feat_q.shape, feat_k.shape)

    B = feat_q.shape[0]
    D = feat_q.shape[1]

    # NCHW-native: (B, C, H, W) -> (B, C, N). Contiguous reshape only; no HBM transpose.
    q = feat_q.reshape(B, D, -1)
    # feat_k is detached in PyTorch -> stop gradient (no-op for the forward value).
    k = lax.stop_gradient(feat_k).reshape(B, D, -1)
    N = q.shape[-1]

    tile = _pick_tile(N)
    nq = N // tile
    nk = nq

    inv_temp = float(1.0 / temperature)
    kernel = functools.partial(_nce_loss_kernel, inv_temp=inv_temp)

    isize = jnp.dtype(q.dtype).itemsize
    cost = pl.CostEstimate(
        flops=int(2 * B * N * N * D + 4 * B * N * N),
        transcendentals=int(B * N * N + B * N),
        bytes_accessed=int(isize * (2 * B * nq * D * N) + 4 * B * nq * 128),
    )

    per_tile = pl.pallas_call(
        kernel,
        out_shape=jax.ShapeDtypeStruct((B, 1, nq * 128), jnp.float32),
        grid_spec=pltpu.PrefetchScalarGridSpec(
            num_scalar_prefetch=0,
            grid=(B, nq, nk),
            in_specs=[
                pl.BlockSpec((1, D, tile), lambda b, i, j: (b, 0, i)),   # q row-tile
                pl.BlockSpec((1, D, tile), lambda b, i, j: (b, 0, j)),   # k kv-tile
            ],
            out_specs=pl.BlockSpec((1, 1, 128), lambda b, i, j: (b, 0, i)),
            scratch_shapes=[
                pltpu.VMEM((tile, 1), jnp.float32),   # running rowsum of exp
                pltpu.VMEM((1, 1), jnp.float32),      # running positive-logit sum
            ],
        ),
        compiler_params=pltpu.CompilerParams(
            # batch and q-row tiles are independent -> parallel (both TCs on v7x);
            # kv axis is the reduction -> arbitrary (innermost).
            dimension_semantics=("parallel", "parallel", "arbitrary"),
            vmem_limit_bytes=48 * 1024 * 1024,
        ),
        cost_estimate=cost,
    )(q, k)

    # Each (b, qi) scalar was broadcast over its 128-lane block; take lane 0 of each.
    per_scalar = per_tile.reshape(B, nq, 128)[:, :, 0]
    total = jnp.sum(per_scalar)
    return total / jnp.float32(B * N)


def _reference_loss(feat_q, feat_k, temperature=0.07):
    """Pure-JAX reference (mirrors the PyTorch module) for sanity checking."""
    B, D = feat_q.shape[0], feat_q.shape[1]
    q = jnp.transpose(feat_q.reshape(B, D, -1), (0, 2, 1)).astype(jnp.float32)
    k = jnp.transpose(feat_k.reshape(B, D, -1), (0, 2, 1)).astype(jnp.float32)
    qn = q / jnp.maximum(jnp.sum(jnp.abs(q), -1, keepdims=True), 1e-12)
    kn = k / jnp.maximum(jnp.sum(jnp.abs(k), -1, keepdims=True), 1e-12)
    N = qn.shape[1]
    pos = jnp.sum(qn * kn, -1)[..., None]                       # (B, N, 1)
    s = jnp.einsum("bnd,bmd->bnm", qn, kn)                      # (B, N, N)
    eye = jnp.eye(N, dtype=bool)[None]
    neg = jnp.where(eye, -jnp.inf, s)
    out = jnp.concatenate([pos, neg], axis=-1) / temperature    # (B, N, N+1)
    out = out.reshape(-1, N + 1)
    lse = jax.scipy.special.logsumexp(out, axis=-1)
    return jnp.mean(lse - out[:, 0])


if __name__ == "__main__":
    key = jax.random.PRNGKey(0)
    kq, kk = jax.random.split(key)

    B, C, H, W = 2, 4, 16, 16
    feat_q = jax.random.normal(kq, (B, C, H, W), dtype=jnp.float32)
    feat_k = jax.random.normal(kk, (B, C, H, W), dtype=jnp.float32)

    loss = jax.block_until_ready(contrastive_loss_sup(feat_q, feat_k))
    ref = jax.block_until_ready(_reference_loss(feat_q, feat_k))

    assert jnp.isfinite(loss), loss
    assert jnp.allclose(loss, ref, rtol=1e-2, atol=1e-3), (loss, ref)
    print("KERNEL_OK")
</pallas_src>

<mosaic_0001>
module attributes {stable_mosaic.version = 11 : i64} {
  func.func @_nce_loss_kernel(%arg0: i32, %arg1: i32, %arg2: i32, %arg3: memref<1x4x256xf32, #tpu.memory_space<vmem>>, %arg4: memref<1x4x256xf32, #tpu.memory_space<vmem>>, %arg5: memref<1x1x128xf32, #tpu.memory_space<vmem>>, %arg6: memref<256x1xf32, #tpu.memory_space<vmem>>, %arg7: memref<1x1xf32, #tpu.memory_space<vmem>>) attributes {dimension_semantics = [#tpu.dimension_semantics<parallel>, #tpu.dimension_semantics<parallel>, #tpu.dimension_semantics<arbitrary>], iteration_bounds = array<i64: 2, 1, 1>, scalar_prefetch = 0 : i64, scratch_operands = 2 : i64, tpu.core_type = #tpu.core_type<tc>, window_params = [{transform_indices = @transform_0, window_bounds = array<i64: 1, 4, 256>}, {transform_indices = @transform_1, window_bounds = array<i64: 1, 4, 256>}, {transform_indices = @transform_2, window_bounds = array<i64: 1, 1, 128>}]} {
    %c0_i32 = arith.constant 0 : i32
    %0 = arith.cmpi eq, %arg2, %c0_i32 : i32
    %1 = arith.extui %0 : i1 to i32
    %c0_i32_0 = arith.constant 0 : i32
    %2 = arith.cmpi ne, %1, %c0_i32_0 : i32
    scf.if %2 {
      %cst_20 = arith.constant 0.000000e+00 : f32
      %38 = vector.broadcast %cst_20 : f32 to vector<256x1xf32>
      %c0_21 = arith.constant 0 : index
      %c0_22 = arith.constant 0 : index
      %39 = vector.load %arg6[%c0_21, %c0_22] : memref<256x1xf32, #tpu.memory_space<vmem>>, vector<256x1xf32>
      tpu.vector_store %arg6[%c0_21, %c0_22], %38 {strides = array<i32>} : memref<256x1xf32, #tpu.memory_space<vmem>>, vector<256x1xf32>,
      %cst_23 = arith.constant 0.000000e+00 : f32
      %40 = vector.broadcast %cst_23 : f32 to vector<1x1xf32>
      %c0_24 = arith.constant 0 : index
      %c0_25 = arith.constant 0 : index
      %41 = vector.load %arg7[%c0_24, %c0_25] : memref<1x1xf32, #tpu.memory_space<vmem>>, vector<1x1xf32>
      tpu.vector_store %arg7[%c0_24, %c0_25], %40 {strides = array<i32>} : memref<1x1xf32, #tpu.memory_space<vmem>>, vector<1x1xf32>,
    } else {
    }
    %c0 = arith.constant 0 : index
    %c0_1 = arith.constant 0 : index
    %c0_2 = arith.constant 0 : index
    %3 = vector.load %arg3[%c0, %c0_1, %c0_2] : memref<1x4x256xf32, #tpu.memory_space<vmem>>, vector<1x4x256xf32>
    %4 = vector.shape_cast %3 : vector<1x4x256xf32> to vector<4x256xf32>
    %c0_3 = arith.constant 0 : index
    %c0_4 = arith.constant 0 : index
    %c0_5 = arith.constant 0 : index
    %5 = vector.load %arg4[%c0_3, %c0_4, %c0_5] : memref<1x4x256xf32, #tpu.memory_space<vmem>>, vector<1x4x256xf32>
    %6 = vector.shape_cast %5 : vector<1x4x256xf32> to vector<4x256xf32>
    %7 = math.absf %4 : vector<4x256xf32>
    %cst = arith.constant dense<0.000000e+00> : vector<256xf32>
    %8 = vector.multi_reduction <add>, %7, %cst [0] : vector<4x256xf32> to vector<256xf32>
    %9 = vector.shape_cast %8 : vector<256xf32> to vector<1x256xf32>
    %cst_6 = arith.constant 9.99999996E-13 : f32
    %10 = vector.broadcast %cst_6 : f32 to vector<1x256xf32>
    %11 = arith.maximumf %9, %10 : vector<1x256xf32>
    %12 = math.absf %6 : vector<4x256xf32>
    %cst_7 = arith.constant dense<0.000000e+00> : vector<256xf32>
    %13 = vector.multi_reduction <add>, %12, %cst_7 [0] : vector<4x256xf32> to vector<256xf32>
    %14 = vector.shape_cast %13 : vector<256xf32> to vector<1x256xf32>
    %cst_8 = arith.constant 9.99999996E-13 : f32
    %15 = vector.broadcast %cst_8 : f32 to vector<1x256xf32>
    %16 = arith.maximumf %14, %15 : vector<1x256xf32>
    %cst_9 = arith.constant 14.2857141 : f32
    %17 = vector.broadcast %cst_9 : f32 to vector<1x256xf32>
    %18 = arith.divf %17, %11 : vector<1x256xf32>
    %19 = vector.broadcast %18 : vector<1x256xf32> to vector<4x256xf32>
    %20 = arith.mulf %4, %19 : vector<4x256xf32>
    %21 = vector.broadcast %16 : vector<1x256xf32> to vector<4x256xf32>
    %22 = arith.divf %6, %21 : vector<4x256xf32>
    %cst_10 = arith.constant dense<0.000000e+00> : vector<256x256xf32>
    %23 = tpu.matmul %20, %22, %cst_10 {dimension_numbers = #tpu.dot_dimension_numbers<[0], [0], [1], [1], [0, 1, 1, 1], [], []>} : vector<4x256xf32>, vector<4x256xf32>, vector<256x256xf32> -> vector<256x256xf32>
    %c0_11 = arith.constant 0 : index
    %c0_12 = arith.constant 0 : index
    %24 = vector.load %arg6[%c0_11, %c0_12] : memref<256x1xf32, #tpu.memory_space<vmem>>, vector<256x1xf32>
    %cst_13 = arith.constant 14.2857141 : f32
    %25 = vector.broadcast %cst_13 : f32 to vector<256x256xf32>
    %26 = arith.subf %23, %25 : vector<256x256xf32>
    %27 = math.exp %26 : vector<256x256xf32>
    %cst_14 = arith.constant dense<0.000000e+00> : vector<256xf32>
    %28 = vector.multi_reduction <add>, %27, %cst_14 [1] : vector<256x256xf32> to vector<256xf32>
    %29 = vector.shape_cast %28 : vector<256xf32> to vector<256x1xf32>
    %30 = arith.addf %24, %29 : vector<256x1xf32>
    %c0_15 = arith.constant 0 : index
    %c0_16 = arith.constant 0 : index
    %31 = vector.load %arg6[%c0_15, %c0_16] : memref<256x1xf32, #tpu.memory_space<vmem>>, vector<256x1xf32>
    tpu.vector_store %arg6[%c0_15, %c0_16], %30 {strides = array<i32>} : memref<256x1xf32, #tpu.memory_space<vmem>>, vector<256x1xf32>,
    %32 = arith.cmpi eq, %arg2, %arg1 : i32
    %33 = arith.extui %32 : i1 to i32
    %c0_i32_17 = arith.constant 0 : i32
    %34 = arith.cmpi ne, %33, %c0_i32_17 : i32
    scf.if %34 {
      %c0_20 = arith.constant 0 : index
      %c0_21 = arith.constant 0 : index
      %38 = vector.load %arg7[%c0_20, %c0_21] : memref<1x1xf32, #tpu.memory_space<vmem>>, vector<1x1xf32>
      %39 = arith.mulf %20, %22 : vector<4x256xf32>
      %40 = vector.shape_cast %39 : vector<4x256xf32> to vector<1x4x256xf32>
      %cst_22 = arith.constant dense<0.000000e+00> : vector<1xf32>
      %41 = vector.multi_reduction <add>, %40, %cst_22 [1, 2] : vector<1x4x256xf32> to vector<1xf32>
      %42 = vector.shape_cast %41 : vector<1xf32> to vector<1x1x1xf32>
      %43 = vector.extract %42[0, 0, 0] : f32 from vector<1x1x1xf32>
      %44 = vector.broadcast %43 : f32 to vector<1x1xf32>
      %45 = arith.addf %38, %44 : vector<1x1xf32>
      %c0_23 = arith.constant 0 : index
      %c0_24 = arith.constant 0 : index
      %46 = vector.load %arg7[%c0_23, %c0_24] : memref<1x1xf32, #tpu.memory_space<vmem>>, vector<1x1xf32>
      tpu.vector_store %arg7[%c0_23, %c0_24], %45 {strides = array<i32>} : memref<1x1xf32, #tpu.memory_space<vmem>>, vector<1x1xf32>,
    } else {
    }
    %c0_i32_18 = arith.constant 0 : i32
    %35 = arith.cmpi eq, %arg2, %c0_i32_18 : i32
    %36 = arith.extui %35 : i1 to i32
    %c0_i32_19 = arith.constant 0 : i32
    %37 = arith.cmpi ne, %36, %c0_i32_19 : i32
    scf.if %37 {
      %c0_20 = arith.constant 0 : index
      %c0_21 = arith.constant 0 : index
      %38 = vector.load %arg6[%c0_20, %c0_21] : memref<256x1xf32, #tpu.memory_space<vmem>>, vector<256x1xf32>
      %cst_22 = arith.constant 1.000000e-30 : f32
      %39 = vector.broadcast %cst_22 : f32 to vector<256x1xf32>
      %40 = arith.maximumf %38, %39 : vector<256x1xf32>
      %41 = math.log %40 : vector<256x1xf32>
      %cst_23 = arith.constant 14.2857141 : f32
      %42 = vector.broadcast %cst_23 : f32 to vector<256x1xf32>
      %43 = arith.addf %42, %41 : vector<256x1xf32>
      %44 = vector.shape_cast %43 : vector<256x1xf32> to vector<1x256x1xf32>
      %cst_24 = arith.constant dense<0.000000e+00> : vector<1xf32>
      %45 = vector.multi_reduction <add>, %44, %cst_24 [1, 2] : vector<1x256x1xf32> to vector<1xf32>
      %46 = vector.shape_cast %45 : vector<1xf32> to vector<1x1x1xf32>
      %47 = vector.extract %46[0, 0, 0] : f32 from vector<1x1x1xf32>
      %c0_25 = arith.constant 0 : index
      %c0_26 = arith.constant 0 : index
      %48 = vector.load %arg7[%c0_25, %c0_26] : memref<1x1xf32, #tpu.memory_space<vmem>>, vector<1x1xf32>
      %49 = vector.extract %48[0, 0] : f32 from vector<1x1xf32>
      %50 = arith.subf %47, %49 : f32
      %51 = vector.broadcast %50 : f32 to vector<1x1x128xf32>
      %c0_27 = arith.constant 0 : index
      %c0_28 = arith.constant 0 : index
      %c0_29 = arith.constant 0 : index
      %52 = vector.load %arg5[%c0_27, %c0_28, %c0_29] : memref<1x1x128xf32, #tpu.memory_space<vmem>>, vector<1x1x128xf32>
      tpu.vector_store %arg5[%c0_27, %c0_28, %c0_29], %51 {strides = array<i32>} : memref<1x1x128xf32, #tpu.memory_space<vmem>>, vector<1x1x128xf32>,
    } else {
    }
    return
  }
  func.func @transform_0(%arg0: i32, %arg1: i32, %arg2: i32) -> (i32, i32, i32) {
    %c0_i32 = arith.constant 0 : i32
    %c0_i32_0 = arith.constant 0 : i32
    return %arg0, %c0_i32, %arg1 : i32, i32, i32
  }
  func.func @transform_1(%arg0: i32, %arg1: i32, %arg2: i32) -> (i32, i32, i32) {
    %c0_i32 = arith.constant 0 : i32
    %c0_i32_0 = arith.constant 0 : i32
    return %arg0, %c0_i32, %arg2 : i32, i32, i32
  }
  func.func @transform_2(%arg0: i32, %arg1: i32, %arg2: i32) -> (i32, i32, i32) {
    %c0_i32 = arith.constant 0 : i32
    %c0_i32_0 = arith.constant 0 : i32
    return %arg0, %c0_i32, %arg1 : i32, i32, i32
  }
}

</mosaic_0001>

<bundles_post_ra>
// kernel: tpu_custom_call.1
= control target key start
LH: loop header
LB: loop body
LE: loop exit
PB: predicated region body
PF: predicated region fallthrough
CT: control target
= control target key end

     0   :  { %7 = vsyncpa [#allocation5], 0  ;;  %s2553_s0 = inlined_call_operand.hbm [shape: f32[2,4,256], index: 0, kind: input, shape index: {}]   ;;  %s2554_s1 = inlined_call_operand.hbm [shape: f32[2,4,256], index: 1, kind: input, shape index: {}]   ;;  %s2555_s2 = inlined_call_operand.hbm [shape: f32[2,1,128], index: 2, kind: output, shape index: {}]  }
   0x1   :  { %9 = vsyncpa [#allocation5 + $0x1], 0 }
   0x2   :  { %10 = vsyncpa [#allocation8], 0 }
   0x3   :  { %12 = vsyncpa [#allocation8 + $0x1], 0 }
   0x4   :  { %13 = vsyncpa [#allocation6], 0 }
   0x5   :  { %15 = vsyncpa [#allocation6 + $0x1], 0  ;;  %s2136_s9 = smov 0   ;;  %s2138_s10 = smov 0  }
   0x6   :  { %s2140_s11 = smov 0   ;;  %s2142_s12 = smov 0  }
   0x7   :  { %s2144_s13 = smov 0   ;;  %s2146_s14 = smov 0  }
   0x8 LB: > { %s1551_s15 = sadd.s32 4294967295, %s2118_s14   ;;  %s1552_s16 = sadd.s32 4294967294, %s2118_s14   ;;  %s2118_s14 = sphi %s2146_s14, %s21_s14   ;;  %s2114_s13 = sphi %s2144_s13, %s2564_s13   ;;  %s2110_s12 = sphi %s2142_s12, %s2563_s12   ;;  %s2106_s11 = sphi %s2140_s11, %s2562_s11   ;;  %s2102_s10 = sphi %s2138_s10, %s2561_s10   ;;  %s2098_s9 = sphi %s2136_s9, %s2560_s9  }
   0x9   : > { %s40_s17 = sadd.s32 1, %s2114_s13  ;;  %s49_s18 = sadd.s32 1, %s2106_s11 }
   0xa   : > { %p42_p0 = scmp.ge.s32.totalorder %s40_s17, 2  ;;  %p56_p1 = scmp.ne.s32.totalorder %s2106_s11, %s2102_s10 }
   0xb   : > { %p57_p2 = scmp.eq.s32.totalorder %s2118_s14, 0  ;;  %p62_p3 = scmp.ne.s32.totalorder %s2102_s10, %s2098_s9 }
   0xc   : > { %s2566_s17 = smov (%p42_p0, %s40_s17), 0  ;;  %p63_p5 = scmp.eq.s32.totalorder %s1551_s15, 0 }
   0xd   : > { %p2177_p4 = por %p57_p2, %p56_p1  ;;  %s44_s20 = ssub.s32 %s2114_s13, %s2566_s17 }
   0xe   : > { %p116_p6 = scmp.eq.s32.totalorder %s1551_s15, 1  ;;  %p47_p7 = scmp.eq.s32.totalorder %s44_s20, 0 }
   0xf   : > { %p2183_p8 = por %p63_p5, %p62_p3  ;;  %p122_p10 = scmp.eq.s32.totalorder %s1552_s16, 1 }
  0x10   : > { %p2187_p9 = por %p116_p6, %p56_p1  ;;  %p1554_p12 = scmp.ge.s32.totalorder %s2118_s14, 2 }
  0x11   : > { %s2192_s23 = scalar_select %p47_p7, %s2106_s11, %s49_s18  }
  0x12   : > { %p2194_p11 = por %p122_p10, %p62_p3  ;;  %p1723_p13 = scmp.lt.s32.totalorder %s2118_s14, 2 }
  0x13   : > { %s142_s25 = sand.u32 1, %s2106_s11   ;;  %s1696_s27 = sshll.u32 %s2114_s13, 3 }
  0x14   : > { %s1555_s26 = sshll.u32 %s142_s25, 3  ;;  %s153_s30 = scalar_lea.hbm %s2553_s0, %s1696_s27 }
  0x15   : > { %s146_s3 = scalar_lea.vmem [#allocation4], %s1555_s26  ;;  %s155_s5 = sshll.u32 %s153_s30, 4  ;;  %s156_s5 = int_to_ptr.hbm [resolvable:$true] %s155_s5 }
  0x16   : > { %s157_s4 = sshll.u32 %s146_s3, 4  ;;  %p1713_p0 = pnand %p1723_p13, %p2177_p4  ;;  %s158_s4 = int_to_ptr.vmem [resolvable:$true] %s157_s4 }
  0x17   : > { %p1561_p1 = scmp.ge.s32.totalorder %s2118_s14, 1  ;;  %p184_p2 = scmp.lt.s32.totalorder %s2118_s14, 3 }
  0x18   : > { %s143_s6 = scalar_lea.sflag [#allocation5], %s142_s25  ;;  %s175_s15 = scalar_lea.hbm %s2554_s1, %s1696_s27 }
  0x19   : > { %1715 = dma.hbm_to_vmem [thread:$0]  (!%p1713_p0), %s156_s5, 128, %s158_s4, %s143_s6  }
  0x1a   : > { %p185_p3 = pnand %p1561_p1, %p184_p2  ;;  %s168_s16 = scalar_lea.vmem [#allocation7], %s1555_s26 }
  0x1b   : > { %s179_s18 = sshll.u32 %s168_s16, 4  ;;  %s177_s20 = sshll.u32 %s175_s15, 4  ;;  %s180_s18 = int_to_ptr.vmem [resolvable:$true] %s179_s18  ;;  %s178_s20 = int_to_ptr.hbm [resolvable:$true] %s177_s20 }
  0x1c   : > { %s165_s28 = scalar_lea.sflag [#allocation8], %s142_s25  ;;  %188 = sbr.rel (%p185_p3) target bundleno = 990 (0x3de), region = 28 }
  0x1d   : > { %1718 = dma.hbm_to_vmem [thread:$0]  (!%p1713_p0), %s178_s20, 128, %s180_s18, %s165_s28  }
  0x1e   : > { %s2213_s19 = sand.u32 (!%p185_p3), 1, %s2102_s10  }
  0x1f   : > { %s1562_s29 = sshll.u32 (!%p185_p3), %s2213_s19, 3  ;;  %s191_s30 = scalar_lea.sflag (!%p185_p3), [#allocation5], %s2213_s19 }
  0x20   : > { %s194_s3 = scalar_lea.vmem (!%p185_p3), [#allocation4], %s1562_s29 }
  0x21   : > { %2085 = dma.done.wait (%p2183_p8), %s191_s30, 128  }
  0x22   : > { %2087 = vsyncadd (%p2183_p8), %s191_s30, 4294967168  ;;  %s201_s26 = scalar_lea.sflag [#allocation8], %s2213_s19  ;;  %s204_s25 = scalar_lea.vmem [#allocation7], %s1562_s29 }
  0x23   : > { %2089 = dma.done.wait (%p2183_p8), %s201_s26, 128  }
  0x24   : > { %2091 = vsyncadd (%p2183_p8), %s201_s26, 4294967168  ;;  %v2226_v0 = vld [vmem:[%s194_s3] sm:$0xff]  ;;  %v2229_v2 = vld [vmem:[%s204_s25] sm:$0xff]  ;;  %vm280_vm0 = vcmask 1043456   ;;  %vm450_vm13 = vcmask 31744   ;;  %vm236_vm14 = vcmask 7168   ;;  %s1440_s5 = scalar_lea.hbm %s2555_s2, %s2110_s12 }
  0x25   : > { %v273_v1 = vand.u32 2147483647, %v2226_v0  ;;  %v297_v3 = vand.u32 2147483647, %v2229_v2  ;;  %vm269_vm15 = vcmask 0   ;;  %s229_s6 = scalar_lea.vmem [#allocation9], %s2213_s19 }
  0x26   : > { %s1442_s7 = sshll.u32 %s229_s6, 4  ;;  %s1444_s15 = sshll.u32 %s1440_s5, 4  ;;  %s1443_s7 = int_to_ptr.vmem [resolvable:$true] %s1442_s7  ;;  %s1445_s15 = int_to_ptr.hbm [resolvable:$true] %s1444_s15 }
  0x27   : > { %275 = vst [vmem:[#allocation1] ss:$2 sm:$0xff] %v273_v1  ;;  %s1431_s20 = scalar_lea.sflag [#allocation6], %s2213_s19  ;;  %s2046_s28 = sshra.s32 %s1445_s15, 4  ;;  %s2047_s28 = int_to_ptr.hbm [resolvable:$true] %s2046_s28 }
  0x28   : > { %s2048_s29 = scalar_lea.hbm %s2047_s28, 1  ;;  %s2052_s3 = scalar_lea.hbm %s2555_s2, 2 }
  0x29   : > { %p2049_p4 = scmp.ne.s32.totalorder %s2047_s28, %s2048_s29  ;;  %p2053_p7 = scmp.lt.s32.totalorder %s2047_s28, %s2555_s2 }
  0x2a   : > { %p2054_p8 = scmp.lt.s32.totalorder %s2052_s3, %s2048_s29 }
  0x2b   : > { %p2050_p5 = pnand %p2049_p4, %p2187_p9 }
  0x2c   : > { %p2055_p10 = por %p2054_p8, %p2053_p7 }
  0x2d   : > { %p2051_p6 = pneg %p2050_p5 }
  0x2e   : > { %v276_v4 = vld.sshfl [vmem:[#allocation1] sm:$0xff pattern:$0x75316420]  ;;  %v277_v5 = vld.sshfl [vmem:[#allocation1 + $0x8] sm:$0xff pattern:$0x75316420] }
  0x2f   : > { %v281_v6 = vsel %vm280_vm0, %v276_v4, 0.0  ;;  %v288_v7 = vsel %vm280_vm0, %v277_v5, 0.0  ;;  %299 = vst [vmem:[#allocation1] ss:$2 sm:$0xff] %v297_v3  ;;  %p2056_p13 = pnand %p2055_p10, %p2051_p6 }
  0x30   : > { %v282_v8 = vrot.slane %v281_v6, 4  ;;  %v289_v9 = vrot.slane %v288_v7, 4 }
  0x32   : > { %v283_v10 = vadd.f32 %v282_v8, %v281_v6  ;;  %v290_v11 = vadd.f32 %v289_v9, %v288_v7 }
  0x34   : > { %v284_v12 = vrot.slane %v283_v10, 2  ;;  %v291_v13 = vrot.slane %v290_v11, 2 }
  0x36   : > { %v285_v14 = vadd.f32 %v284_v12, %v283_v10  ;;  %v292_v15 = vadd.f32 %v291_v13, %v290_v11  ;;  %v300_v16 = vld.sshfl [vmem:[#allocation1] sm:$0xff pattern:$0x75316420]  ;;  %v301_v17 = vld.sshfl [vmem:[#allocation1 + $0x8] sm:$0xff pattern:$0x75316420] }
  0x37   : > { %v304_v18 = vsel %vm280_vm0, %v300_v16, 0.0  ;;  %v311_v19 = vsel %vm280_vm0, %v301_v17, 0.0 }
  0x38   : > { %v286_v20 = vrot.slane %v285_v14, 1  ;;  %v293_v21 = vrot.slane %v292_v15, 1  ;;  %v305_v22 = vrot.slane %v304_v18, 4  ;;  %v312_v23 = vrot.slane %v311_v19, 4 }
  0x3a   : > { %v287_v24 = vadd.f32 %v286_v20, %v285_v14  ;;  %v294_v25 = vadd.f32 %v293_v21, %v292_v15  ;;  %v306_v26 = vadd.f32 %v305_v22, %v304_v18  ;;  %v313_v27 = vadd.f32 %v312_v23, %v311_v19 }
  0x3c   : > { %v295_v28 = vmax.f32 %v287_v24, 1e-12  ;;  %v296_v29 = vmax.f32 %v294_v25, 1e-12  ;;  %v307_v30 = vrot.slane %v306_v26, 2  ;;  %v314_v31 = vrot.slane %v313_v27, 2 }
  0x3e   : > { %v308_v32 = vadd.f32 %v307_v30, %v306_v26  ;;  %v315_v33 = vadd.f32 %v314_v31, %v313_v27  ;;  %1774 = vrcp.f32 %v295_v28  ;;  %vm325_vm1 = vweird.f32 %v295_v28 }
  0x3f   : > { %1776 = vrcp.f32 %v296_v29  ;;  %v329_v43 = vand.u32 2147483647, %v295_v28  ;;  %v331_v44 = vand.u32 2147483648, %v295_v28  ;;  %vm340_vm3 = vweird.f32 %v296_v29 }
  0x40   : > { %v309_v34 = vrot.slane %v308_v32, 1  ;;  %v316_v35 = vrot.slane %v315_v33, 1  ;;  %v346_v48 = vand.u32 2147483648, %v296_v29  ;;  %v344_v50 = vand.u32 2147483647, %v296_v29 }
  0x41   : > { %v332_v53 = vor.u32 1.1754944e-38, %v331_v44  ;;  %vm330_vm6 = vcmp.eq.f32.partialorder %v329_v43, 8.507059e+37 }
  0x42   : > { %v310_v36 = vadd.f32 %v309_v34, %v308_v32  ;;  %v317_v37 = vadd.f32 %v316_v35, %v315_v33  ;;  %v347_v56 = vor.u32 1.1754944e-38, %v346_v48  ;;  %vm345_vm8 = vcmp.eq.f32.partialorder %v344_v50, 8.507059e+37 }
  0x44   : > { %v1775_v38 = vpop.eup %1774  ;;  %v318_v39 = vmax.f32 %v310_v36, 1e-12  ;;  %v319_v40 = vmax.f32 %v317_v37, 1e-12 }
  0x45   : > { %v1777_v41 = vpop.eup %1776  ;;  %v321_v42 = vmul.f32 %v1775_v38, %v295_v28  ;;  %vm326_vm2 = vweird.f32 %v1775_v38 }
  0x46   : > { %v336_v45 = vmul.f32 %v1777_v41, %v296_v29  ;;  %v358_v46 = vrot.slane %v319_v40, 4  ;;  %vm341_vm4 = vweird.f32 %v1777_v41  ;;  %vm327_vm5 = vmor %vm325_vm1, %vm326_vm2 }
  0x47   : > { %v322_v47 = vsub.f32 1.0, %v321_v42  ;;  %vm342_vm7 = vmor %vm340_vm3, %vm341_vm4 }
  0x48   : > { %v337_v49 = vsub.f32 1.0, %v336_v45  ;;  %v359_v51 = vsel %vm280_vm0, %v318_v39, %v358_v46 }
  0x49   : > { %v323_v52 = vmul.f32 %v1775_v38, %v322_v47  ;;  %1778 = vrcp.f32 %v359_v51  ;;  %vm366_vm9 = vweird.f32 %v359_v51  ;;  %v372_v4 = vand.u32 2147483648, %v359_v51 }
  0x4a   : > { %v338_v54 = vmul.f32 %v1777_v41, %v337_v49  ;;  %v370_v7 = vand.u32 2147483647, %v359_v51 }
  0x4b   : > { %v324_v55 = vadd.f32 %v1775_v38, %v323_v52  ;;  %v373_v11 = vor.u32 1.1754944e-38, %v372_v4 }
  0x4c   : > { %v339_v57 = vadd.f32 %v1777_v41, %v338_v54  ;;  %vm371_vm12 = vcmp.eq.f32.partialorder %v370_v7, 8.507059e+37 }
  0x4d   : > { %v328_v58 = vsel %vm327_vm5, %v1775_v38, %v324_v55 }
  0x4e   : > { %v333_v59 = vsel %vm330_vm6, %v332_v53, %v328_v58  ;;  %v343_v60 = vsel %vm342_vm7, %v1777_v41, %v339_v57 }
  0x4f   : > { %v1779_v61 = vpop.eup %1778  ;;  %v348_v62 = vsel %vm345_vm8, %v347_v56, %v343_v60  ;;  %v334_v63 = vmul.f32 14.285714, %v333_v59  ;;  %v2120_v60 = vmov 0.0  }
  0x50   : > { %v349_v1 = vmul.f32 14.285714, %v348_v62  ;;  %v362_v3 = vmul.f32 %v1779_v61, %v359_v51  ;;  %vm367_vm10 = vweird.f32 %v1779_v61  ;;  %237 = vst.msk [vmem:[#allocation2] sm:$0xff] %vm236_vm14, %v2120_v60 }
  0x51   : > { %vm368_vm11 = vmor %vm366_vm9, %vm367_vm10  ;;  %238 = vst.msk [vmem:[#allocation2 + $0x8] sm:$0xff] %vm236_vm14, %v2120_v60 }
  0x52   : > { %v352_v5 = vrot.slane %v349_v1, 4  ;;  %v363_v6 = vsub.f32 1.0, %v362_v3  ;;  %239 = vst.msk [vmem:[#allocation2 + $0x10] sm:$0xff] %vm236_vm14, %v2120_v60 }
  0x53   : > { %240 = vst.msk [vmem:[#allocation2 + $0x18] sm:$0xff] %vm236_vm14, %v2120_v60 }
  0x54   : > { %v353_v8 = vsel %vm280_vm0, %v334_v63, %v352_v5  ;;  %v364_v9 = vmul.f32 %v1779_v61, %v363_v6  ;;  %241 = vst.msk [vmem:[#allocation2 + $0x20] sm:$0xff] %vm236_vm14, %v2120_v60 }
  0x55   : > { %v355_v10 = vmul.f32 %v353_v8, %v2226_v0  ;;  %242 = vst.msk [vmem:[#allocation2 + $0x28] sm:$0xff] %vm236_vm14, %v2120_v60 }
  0x56   : > { %v365_v12 = vadd.f32 %v1779_v61, %v364_v9  ;;  %243 = vst.msk [vmem:[#allocation2 + $0x30] sm:$0xff] %vm236_vm14, %v2120_v60 }
  0x57   : > { %377 = vst [vmem:[#allocation1] ss:$2 sm:$0xff] %v355_v10 }
  0x58   : > { %v369_v13 = vsel %vm368_vm11, %v1779_v61, %v365_v12  ;;  %244 = vst.msk [vmem:[#allocation2 + $0x38] sm:$0xff] %vm236_vm14, %v2120_v60 }
  0x59   : > { %v374_v14 = vsel %vm371_vm12, %v373_v11, %v369_v13  ;;  %245 = vst.msk [vmem:[#allocation2 + $0x40] sm:$0xff] %vm236_vm14, %v2120_v60  ;;  %v777_v11 = vld [vmem:[#allocation2] sm:$0xff] }
  0x5a   : > { %v375_v15 = vmul.f32 %v374_v14, %v2229_v2  ;;  %246 = vst.msk [vmem:[#allocation2 + $0x48] sm:$0xff] %vm236_vm14, %v2120_v60 }
  0x5b   : > { %247 = vst.msk [vmem:[#allocation2 + $0x50] sm:$0xff] %vm236_vm14, %v2120_v60 }
  0x5c   : > { %v1167_v16 = vmul.f32 %v375_v15, %v355_v10  ;;  %248 = vst.msk [vmem:[#allocation2 + $0x58] sm:$0xff] %vm236_vm14, %v2120_v60 }
  0x5d   : > { %249 = vst.msk [vmem:[#allocation2 + $0x60] sm:$0xff] %vm236_vm14, %v2120_v60 }
  0x5e   : > { %v378_v17 = vld.sshfl [vmem:[#allocation1] sm:$0xff pattern:$0x75316420]  ;;  %v379_v18 = vld.sshfl [vmem:[#allocation1 + $0x8] sm:$0xff pattern:$0x75316420] }
  0x5f   : > { %382 = vxpose.xlu0.b32.start.end [1/1] (short) %v378_v17, 128  ;;  %447 = vst [vmem:[#allocation1] ss:$2 sm:$0xff] %v375_v15 }
  0x60   : > { %250 = vst.msk [vmem:[#allocation2 + $0x68] sm:$0xff] %vm236_vm14, %v2120_v60 }
  0x61   : > { %251 = vst.msk [vmem:[#allocation2 + $0x70] sm:$0xff] %vm236_vm14, %v2120_v60 }
  0x62   : > { %252 = vst.msk [vmem:[#allocation2 + $0x78] sm:$0xff] %vm236_vm14, %v2120_v60 }
  0x63   : > { %253 = vst.msk [vmem:[#allocation2 + $0x80] sm:$0xff] %vm236_vm14, %v2120_v60 }
  0x64   : > { %254 = vst.msk [vmem:[#allocation2 + $0x88] sm:$0xff] %vm236_vm14, %v2120_v60 }
  0x65   : > { %255 = vst.msk [vmem:[#allocation2 + $0x90] sm:$0xff] %vm236_vm14, %v2120_v60 }
  0x66   : > { %v448_v19 = vld.sshfl [vmem:[#allocation1] sm:$0xff pattern:$0x75316420]  ;;  %v449_v20 = vld.sshfl [vmem:[#allocation1 + $0x8] sm:$0xff pattern:$0x75316420] }
  0x67   : > { %1564 = vmatpush.msk.msra.mxu0 %vm280_vm0, %v448_v19  ;;  %1597 = vmatpush.msk.msra.mxu1 %vm280_vm0, %v449_v20  ;;  %1169 = vst [vmem:[#allocation1] ss:$2 sm:$0xff] %v1167_v16 }
  0x68   : > { %1698 = vmatpush.msk.msra.mxu2 %vm280_vm0, %v448_v19  ;;  %1699 = vmatpush.msk.msra.mxu3 %vm280_vm0, %v449_v20  ;;  %256 = vst.msk [vmem:[#allocation2 + $0x98] sm:$0xff] %vm236_vm14, %v2120_v60 }
  0x69   : > { %257 = vst.msk [vmem:[#allocation2 + $0xa0] sm:$0xff] %vm236_vm14, %v2120_v60 }
  0x6a   : > { %258 = vst.msk [vmem:[#allocation2 + $0xa8] sm:$0xff] %vm236_vm14, %v2120_v60 }
  0x6b   : > { %259 = vst.msk [vmem:[#allocation2 + $0xb0] sm:$0xff] %vm236_vm14, %v2120_v60 }
  0x6c   : > { %260 = vst.msk [vmem:[#allocation2 + $0xb8] sm:$0xff] %vm236_vm14, %v2120_v60 }
  0x6d   : > { %261 = vst.msk [vmem:[#allocation2 + $0xc0] sm:$0xff] %vm236_vm14, %v2120_v60 }
  0x6e   : > { %262 = vst.msk [vmem:[#allocation2 + $0xc8] sm:$0xff] %vm236_vm14, %v2120_v60 }
  0x6f   : > { %263 = vst.msk [vmem:[#allocation2 + $0xd0] sm:$0xff] %vm236_vm14, %v2120_v60 }
  0x70   : > { %264 = vst.msk [vmem:[#allocation2 + $0xd8] sm:$0xff] %vm236_vm14, %v2120_v60 }
  0x71   : > { %265 = vst.msk [vmem:[#allocation2 + $0xe0] sm:$0xff] %vm236_vm14, %v2120_v60 }
  0x72   : > { %266 = vst.msk [vmem:[#allocation2 + $0xe8] sm:$0xff] %vm236_vm14, %v2120_v60 }
  0x73   : > { %267 = vst.msk [vmem:[#allocation2 + $0xf0] sm:$0xff] %vm236_vm14, %v2120_v60 }
  0x74   : > { %268 = vst.msk [vmem:[#allocation2 + $0xf8] sm:$0xff] %vm236_vm14, %v2120_v60 }
  0x75   : > { %270 = vst.msk [vmem:[#allocation3] sm:$0x1] %vm269_vm15, %v2120_v60 }
  0xdf   : > { %414 = vxpose.xlu0.b32.start.end [1/1] (short) %v379_v18, 128 }
 0x103   : > { %v398_v0 = vpop.trf.xlu0 }
 0x104   : > { %1565 = vmatmul.msk.f32.vlgmr.msra.gmra.mxu0 %vm450_vm13, %v398_v0  ;;  %1598 = vmatmul.msk.f32.vlgmr.msra.gmra.mxu1 %vm450_vm13, %v398_v0 }
 0x10b   : > { %v399_v2 = vpop.trf.xlu0 }
 0x10c   : > { %1566 = vmatmul.msk.f32.gmra.mxu0 %vm450_vm13, %v399_v2  ;;  %1599 = vmatmul.msk.f32.gmra.mxu1 %vm450_vm13, %v399_v2 }
 0x113   : > { %v400_v21 = vpop.trf.xlu0 }
 0x114   : > { %1567 = vmatmul.msk.f32.gmra.mxu0 %vm450_vm13, %v400_v21  ;;  %1600 = vmatmul.msk.f32.gmra.mxu1 %vm450_vm13, %v400_v21 }
 0x11b   : > { %v401_v22 = vpop.trf.xlu0 }
 0x11c   : > { %1568 = vmatmul.msk.f32.gmra.mxu0 %vm450_vm13, %v401_v22  ;;  %1601 = vmatmul.msk.f32.gmra.mxu1 %vm450_vm13, %v401_v22 }
 0x123   : > { %v402_v23 = vpop.trf.xlu0 }
 0x124   : > { %1569 = vmatmul.msk.f32.gmra.mxu0 %vm450_vm13, %v402_v23  ;;  %1602 = vmatmul.msk.f32.gmra.mxu1 %vm450_vm13, %v402_v23 }
 0x12b   : > { %v403_v24 = vpop.trf.xlu0 }
 0x12c   : > { %1570 = vmatmul.msk.f32.gmra.mxu0 %vm450_vm13, %v403_v24  ;;  %1603 = vmatmul.msk.f32.gmra.mxu1 %vm450_vm13, %v403_v24 }
 0x133   : > { %v404_v25 = vpop.trf.xlu0 }
 0x134   : > { %1571 = vmatmul.msk.f32.gmra.mxu0 %vm450_vm13, %v404_v25  ;;  %1604 = vmatmul.msk.f32.gmra.mxu1 %vm450_vm13, %v404_v25 }
 0x13b   : > { %v405_v26 = vpop.trf.xlu0 }
 0x13c   : > { %1572 = vmatmul.msk.f32.gmra.mxu0 %vm450_vm13, %v405_v26  ;;  %1605 = vmatmul.msk.f32.gmra.mxu1 %vm450_vm13, %v405_v26 }
 0x143   : > { %v406_v27 = vpop.trf.xlu0 }
 0x144   : > { %1573 = vmatmul.msk.f32.gmra.mxu0 %vm450_vm13, %v406_v27  ;;  %1606 = vmatmul.msk.f32.gmra.mxu1 %vm450_vm13, %v406_v27 }
 0x14b   : > { %v407_v28 = vpop.trf.xlu0 }
 0x14c   : > { %1574 = vmatmul.msk.f32.gmra.mxu0 %vm450_vm13, %v407_v28  ;;  %1607 = vmatmul.msk.f32.gmra.mxu1 %vm450_vm13, %v407_v28 }
 0x153   : > { %v408_v29 = vpop.trf.xlu0 }
 0x154   : > { %1575 = vmatmul.msk.f32.gmra.mxu0 %vm450_vm13, %v408_v29  ;;  %1608 = vmatmul.msk.f32.gmra.mxu1 %vm450_vm13, %v408_v29 }
 0x15b   : > { %v409_v30 = vpop.trf.xlu0 }
 0x15c   : > { %1576 = vmatmul.msk.f32.gmra.mxu0 %vm450_vm13, %v409_v30  ;;  %1609 = vmatmul.msk.f32.gmra.mxu1 %vm450_vm13, %v409_v30 }
 0x163   : > { %v410_v31 = vpop.trf.xlu0 }
 0x164   : > { %1577 = vmatmul.msk.f32.gmra.mxu0 %vm450_vm13, %v410_v31  ;;  %1610 = vmatmul.msk.f32.gmra.mxu1 %vm450_vm13, %v410_v31 }
 0x16b   : > { %v411_v32 = vpop.trf.xlu0 }
 0x16c   : > { %1578 = vmatmul.msk.f32.gmra.mxu0 %vm450_vm13, %v411_v32  ;;  %1611 = vmatmul.msk.f32.gmra.mxu1 %vm450_vm13, %v411_v32 }
 0x173   : > { %v412_v33 = vpop.trf.xlu0 }
 0x174   : > { %1579 = vmatmul.msk.f32.gmra.mxu0 %vm450_vm13, %v412_v33  ;;  %1612 = vmatmul.msk.f32.gmra.mxu1 %vm450_vm13, %v412_v33 }
 0x17b   : > { %v413_v34 = vpop.trf.xlu0 }
 0x17c   : > { %1580 = vmatmul.msk.f32.gmra.mxu0 %vm450_vm13, %v413_v34  ;;  %1613 = vmatmul.msk.f32.gmra.mxu1 %vm450_vm13, %v413_v34 }
 0x181   : > { %v568_v35 = vpop.f32.mrf.mxu0  ;;  %v681_v36 = vpop.f32.mrf.mxu1 }
 0x182   : > { %v1630_v37 = vadd.f32 -14.285714, %v568_v35  ;;  %v1631_v38 = vadd.f32 -14.285714, %v681_v36 }
 0x183   : > { %v430_v39 = vpop.trf.xlu0 }
 0x184   : > { %v873_v40 = vmul.f32 1.442695, %v1630_v37  ;;  %v875_v41 = vmul.f32 1.442695, %v1631_v38  ;;  %1581 = vmatmul.msk.f32.vlgmr.msra.gmra.mxu2 %vm450_vm13, %v430_v39  ;;  %1614 = vmatmul.msk.f32.vlgmr.msra.gmra.mxu3 %vm450_vm13, %v430_v39 }
 0x186   : > { %1780 = vpow2.f32 %v873_v40 }
 0x187   : > { %1782 = vpow2.f32 %v875_v41 }
 0x189   : > { %v2295_v54 = vpop.f32.mrf.mxu0  ;;  %v2299_v55 = vpop.f32.mrf.mxu1 }
 0x18a   : > { %v1632_v19 = vadd.f32 -14.285714, %v2295_v54  ;;  %v1633_v21 = vadd.f32 -14.285714, %v2299_v55 }
 0x18b   : > { %v431_v42 = vpop.trf.xlu0 }
 0x18c   : > { %v1781_v43 = vpop.eup %1780  ;;  %1582 = vmatmul.msk.f32.gmra.mxu2 %vm450_vm13, %v431_v42  ;;  %1615 = vmatmul.msk.f32.gmra.mxu3 %vm450_vm13, %v431_v42  ;;  %v877_v22 = vmul.f32 1.442695, %v1632_v19  ;;  %v879_v23 = vmul.f32 1.442695, %v1633_v21 }
 0x18d   : > { %v1783_v44 = vpop.eup %1782 }
 0x18e   : > { %v1001_v45 = vadd.f32 %v1783_v44, %v1781_v43 }
 0x190   : > { %1002 = vadd.xlane.f32.xlu1 %v1001_v45 }
 0x191   : > { %v2303_v57 = vpop.f32.mrf.mxu0  ;;  %v2305_v58 = vpop.f32.mrf.mxu1 }
 0x192   : > { %v1634_v29 = vadd.f32 -14.285714, %v2303_v57  ;;  %v1635_v34 = vadd.f32 -14.285714, %v2305_v58 }
 0x193   : > { %v432_v46 = vpop.trf.xlu0 }
 0x194   : > { %1583 = vmatmul.msk.f32.gmra.mxu2 %vm450_vm13, %v432_v46  ;;  %1616 = vmatmul.msk.f32.gmra.mxu3 %vm450_vm13, %v432_v46  ;;  %v881_v37 = vmul.f32 1.442695, %v1634_v29  ;;  %v883_v38 = vmul.f32 1.442695, %v1635_v34 }
 0x199   : > { %v2317_v61 = vpop.f32.mrf.mxu0  ;;  %v2323_v62 = vpop.f32.mrf.mxu1 }
 0x19a   : > { %v1636_v42 = vadd.f32 -14.285714, %v2317_v61  ;;  %v1637_v46 = vadd.f32 -14.285714, %v2323_v62 }
 0x19b   : > { %v433_v47 = vpop.trf.xlu0 }
 0x19c   : > { %1584 = vmatmul.msk.f32.gmra.mxu2 %vm450_vm13, %v433_v47  ;;  %1617 = vmatmul.msk.f32.gmra.mxu3 %vm450_vm13, %v433_v47  ;;  %v887_v57 = vmul.f32 1.442695, %v1637_v46 }
 0x1a1   : > { %v2343_v1 = vpop.f32.mrf.mxu0  ;;  %v2349_v4 = vpop.f32.mrf.mxu1 }
 0x1a3   : > { %v434_v48 = vpop.trf.xlu0 }
 0x1a4   : > { %1585 = vmatmul.msk.f32.gmra.mxu2 %vm450_vm13, %v434_v48  ;;  %1618 = vmatmul.msk.f32.gmra.mxu3 %vm450_vm13, %v434_v48  ;;  %v1638_v48 = vadd.f32 -14.285714, %v2343_v1 }
 0x1a6   : > { %v889_v58 = vmul.f32 1.442695, %v1638_v48 }
 0x1a9   : > { %v2369_v6 = vpop.f32.mrf.mxu0  ;;  %v2377_v7 = vpop.f32.mrf.mxu1 }
 0x1ab   : > { %v435_v49 = vpop.trf.xlu0 }
 0x1ac   : > { %1586 = vmatmul.msk.f32.gmra.mxu2 %vm450_vm13, %v435_v49  ;;  %1619 = vmatmul.msk.f32.gmra.mxu3 %vm450_vm13, %v435_v49 }
 0x1b1   : > { %v2393_v9 = vpop.f32.mrf.mxu0  ;;  %v2395_v10 = vpop.f32.mrf.mxu1 }
 0x1b3   : > { %v436_v50 = vpop.trf.xlu0 }
 0x1b4   : > { %1587 = vmatmul.msk.f32.gmra.mxu2 %vm450_vm13, %v436_v50  ;;  %1620 = vmatmul.msk.f32.gmra.mxu3 %vm450_vm13, %v436_v50 }
 0x1b9   : > { %v2398_v16 = vpop.f32.mrf.mxu0  ;;  %v2401_v20 = vpop.f32.mrf.mxu1 }
 0x1bb   : > { %v437_v51 = vpop.trf.xlu0 }
 0x1bc   : > { %1588 = vmatmul.msk.f32.gmra.mxu2 %vm450_vm13, %v437_v51  ;;  %1621 = vmatmul.msk.f32.gmra.mxu3 %vm450_vm13, %v437_v51 }
 0x1c1   : > { %v2405_v30 = vpop.f32.mrf.mxu0  ;;  %v2408_v35 = vpop.f32.mrf.mxu1 }
 0x1c3   : > { %v438_v52 = vpop.trf.xlu0 }
 0x1c4   : > { %1589 = vmatmul.msk.f32.gmra.mxu2 %vm450_vm13, %v438_v52  ;;  %1622 = vmatmul.msk.f32.gmra.mxu3 %vm450_vm13, %v438_v52  ;;  %v1639_v52 = vadd.f32 -14.285714, %v2349_v4 }
 0x1c6   : > { %v891_v61 = vmul.f32 1.442695, %v1639_v52 }
 0x1c9   : > { %v2414_v54 = vpop.f32.mrf.mxu0 }
 0x1cb   : > { %v439_v53 = vpop.trf.xlu0 }
 0x1cc   : > { %1590 = vmatmul.msk.f32.gmra.mxu2 %vm450_vm13, %v439_v53  ;;  %1623 = vmatmul.msk.f32.gmra.mxu3 %vm450_vm13, %v439_v53  ;;  %v885_v53 = vmul.f32 1.442695, %v1636_v42 }
 0x1d3   : > { %v440_v56 = vpop.trf.xlu0 }
 0x1d4   : > { %1591 = vmatmul.msk.f32.gmra.mxu2 %vm450_vm13, %v440_v56  ;;  %1624 = vmatmul.msk.f32.gmra.mxu3 %vm450_vm13, %v440_v56 }
 0x1db   : > { %v441_v59 = vpop.trf.xlu0 }
 0x1dc   : > { %1592 = vmatmul.msk.f32.gmra.mxu2 %vm450_vm13, %v441_v59  ;;  %1625 = vmatmul.msk.f32.gmra.mxu3 %vm450_vm13, %v441_v59  ;;  %v2416_v59 = vpop.f32.mrf.mxu1 }
 0x1e3   : > { %v442_v63 = vpop.trf.xlu0 }
 0x1e4   : > { %1593 = vmatmul.msk.f32.gmra.mxu2 %vm450_vm13, %v442_v63  ;;  %1626 = vmatmul.msk.f32.gmra.mxu3 %vm450_vm13, %v442_v63 }
 0x1eb   : > { %v443_v3 = vpop.trf.xlu0 }
 0x1ec   : > { %1594 = vmatmul.msk.f32.gmra.mxu2 %vm450_vm13, %v443_v3  ;;  %1627 = vmatmul.msk.f32.gmra.mxu3 %vm450_vm13, %v443_v3 }
 0x1f3   : > { %v444_v5 = vpop.trf.xlu0 }
 0x1f4   : > { %1595 = vmatmul.msk.f32.gmra.mxu2 %vm450_vm13, %v444_v5  ;;  %1628 = vmatmul.msk.f32.gmra.mxu3 %vm450_vm13, %v444_v5 }
 0x1fb   : > { %v445_v8 = vpop.trf.xlu0 }
 0x1fc   : > { %1596 = vmatmul.msk.f32.gmra.mxu2 %vm450_vm13, %v445_v8  ;;  %1629 = vmatmul.msk.f32.gmra.mxu3 %vm450_vm13, %v445_v8 }
 0x203   : > { %v1003_v12 = vpop.xlane.xlu1 %1002 }
 0x204   : > { %v1097_v13 = vadd.f32 %v1003_v12, %v777_v11 }
 0x206   : > { %1130 = vst.msk [vmem:[#allocation2] sm:$0xff] %vm236_vm14, %v1097_v13 }
 0x207   : > { %v616_v14 = vpop.f32.mrf.mxu2  ;;  %v729_v15 = vpop.f32.mrf.mxu3 }
 0x208   : > { %v1662_v17 = vadd.f32 -14.285714, %v616_v14  ;;  %v1663_v18 = vadd.f32 -14.285714, %v729_v15 }
 0x20a   : > { %v937_v0 = vmul.f32 1.442695, %v1662_v17  ;;  %v939_v2 = vmul.f32 1.442695, %v1663_v18  ;;  %v2418_v18 = vpop.f32.mrf.mxu0 }
 0x20c   : > { %1784 = vpow2.f32 %v937_v0 }
 0x20d   : > { %1786 = vpow2.f32 %v939_v2 }
 0x20e   : > { %1788 = vpow2.f32 %v877_v22  ;;  %v1640_v22 = vadd.f32 -14.285714, %v2369_v6 }
 0x20f   : > { %v619_v24 = vpop.f32.mrf.mxu2  ;;  %v732_v25 = vpop.f32.mrf.mxu3  ;;  %1790 = vpow2.f32 %v879_v23 }
 0x210   : > { %v1664_v26 = vadd.f32 -14.285714, %v619_v24  ;;  %v1665_v27 = vadd.f32 -14.285714, %v732_v25  ;;  %v2421_v23 = vpop.f32.mrf.mxu1 }
 0x212   : > { %v1785_v28 = vpop.eup %1784  ;;  %v941_v31 = vmul.f32 1.442695, %v1664_v26  ;;  %v943_v32 = vmul.f32 1.442695, %v1665_v27  ;;  %v1641_v27 = vadd.f32 -14.285714, %v2377_v7 }
 0x213   : > { %v1787_v33 = vpop.eup %1786 }
 0x214   : > { %1792 = vpow2.f32 %v941_v31  ;;  %v1049_v36 = vadd.f32 %v1787_v33, %v1785_v28  ;;  %v1789_v41 = vpop.eup %1788  ;;  %v1642_v28 = vadd.f32 -14.285714, %v2393_v9  ;;  %v893_v33 = vmul.f32 1.442695, %v1640_v22  ;;  %v2426_v9 = vpop.f32.mrf.mxu0 }
 0x215   : > { %1794 = vpow2.f32 %v943_v32  ;;  %v1791_v45 = vpop.eup %1790  ;;  %v1643_v32 = vadd.f32 -14.285714, %v2395_v10  ;;  %v895_v6 = vmul.f32 1.442695, %v1641_v27 }
 0x216   : > { %1050 = vadd.xlane.f32.xlu1 %v1049_v36  ;;  %1796 = vpow2.f32 %v881_v37  ;;  %v1004_v56 = vadd.f32 %v1791_v45, %v1789_v41 }
 0x217   : > { %v622_v39 = vpop.f32.mrf.mxu2  ;;  %v735_v40 = vpop.f32.mrf.mxu3  ;;  %1798 = vpow2.f32 %v883_v38  ;;  %v897_v38 = vmul.f32 1.442695, %v1642_v28 }
 0x218   : > { %v1666_v43 = vadd.f32 -14.285714, %v622_v39  ;;  %v1667_v44 = vadd.f32 -14.285714, %v735_v40  ;;  %v899_v40 = vmul.f32 1.442695, %v1643_v32 }
 0x21a   : > { %v1793_v47 = vpop.eup %1792  ;;  %v945_v49 = vmul.f32 1.442695, %v1666_v43  ;;  %v947_v50 = vmul.f32 1.442695, %v1667_v44  ;;  %v2428_v44 = vpop.f32.mrf.mxu1 }
 0x21b   : > { %v1795_v51 = vpop.eup %1794 }
 0x21c   : > { %1800 = vpow2.f32 %v945_v49  ;;  %v1052_v55 = vadd.f32 %v1795_v51, %v1793_v47  ;;  %v1797_v1 = vpop.eup %1796 }
 0x21d   : > { %1802 = vpow2.f32 %v947_v50  ;;  %v1799_v4 = vpop.eup %1798 }
 0x21e   : > { %1053 = vadd.xlane.f32.xlu2 %v1052_v55  ;;  %1005 = vadd.xlane.f32.xlu1 %v1004_v56  ;;  %1804 = vpow2.f32 %v885_v53  ;;  %v1007_v14 = vadd.f32 %v1799_v4, %v1797_v1  ;;  %v1644_v56 = vadd.f32 -14.285714, %v2398_v16  ;;  %v604_v1 = vpop.f32.mrf.mxu0 }
 0x21f   : > { %v625_v62 = vpop.f32.mrf.mxu2  ;;  %v738_v63 = vpop.f32.mrf.mxu3  ;;  %1806 = vpow2.f32 %v887_v57 }
 0x220   : > { %v1668_v3 = vadd.f32 -14.285714, %v625_v62  ;;  %v1669_v5 = vadd.f32 -14.285714, %v738_v63  ;;  %1808 = vpow2.f32 %v889_v58  ;;  %v1645_v62 = vadd.f32 -14.285714, %v2401_v20 }
 0x221   : > { %1810 = vpow2.f32 %v891_v61  ;;  %v1646_v63 = vadd.f32 -14.285714, %v2405_v30 }
 0x222   : > { %v1801_v8 = vpop.eup %1800  ;;  %v949_v12 = vmul.f32 1.442695, %v1668_v3  ;;  %v951_v15 = vmul.f32 1.442695, %v1669_v5  ;;  %v1647_v5 = vadd.f32 -14.285714, %v2408_v35 }
 0x223   : > { %v1803_v11 = vpop.eup %1802  ;;  %v903_v16 = vmul.f32 1.442695, %v1645_v62 }
 0x224   : > { %v1055_v13 = vadd.f32 %v1803_v11, %v1801_v8  ;;  %v1805_v17 = vpop.eup %1804  ;;  %1812 = vpow2.f32 %v949_v12  ;;  %v901_v8 = vmul.f32 1.442695, %v1644_v56  ;;  %v717_v11 = vpop.f32.mrf.mxu1 }
 0x225   : > { %v1807_v19 = vpop.eup %1806  ;;  %1814 = vpow2.f32 %v951_v15  ;;  %v905_v15 = vmul.f32 1.442695, %v1646_v63 }
 0x226   : > { %1056 = vadd.xlane.f32.xlu1 %v1055_v13  ;;  %1008 = vadd.xlane.f32.xlu2 %v1007_v14  ;;  %v1809_v21 = vpop.eup %1808  ;;  %v1010_v34 = vadd.f32 %v1807_v19, %v1805_v17  ;;  %v907_v17 = vmul.f32 1.442695, %v1647_v5 }
 0x227   : > { %v628_v0 = vpop.f32.mrf.mxu2  ;;  %v741_v2 = vpop.f32.mrf.mxu3 }
 0x228   : > { %v1670_v24 = vadd.f32 -14.285714, %v628_v0  ;;  %v1671_v25 = vadd.f32 -14.285714, %v741_v2  ;;  %v1811_v26 = vpop.eup %1810 }
 0x229   : > { %v1013_v36 = vadd.f32 %v1811_v26, %v1809_v21  ;;  %v1650_v21 = vadd.f32 -14.285714, %v2418_v18  ;;  %v607_v26 = vpop.f32.mrf.mxu0  ;;  %v1648_v18 = vadd.f32 -14.285714, %v2414_v54 }
 0x22a   : > { %v953_v29 = vmul.f32 1.442695, %v1670_v24  ;;  %v955_v31 = vmul.f32 1.442695, %v1671_v25  ;;  %v1813_v37 = vpop.eup %1812  ;;  %v1651_v25 = vadd.f32 -14.285714, %v2421_v23 }
 0x22b   : > { %v1815_v39 = vpop.eup %1814  ;;  %v913_v32 = vmul.f32 1.442695, %v1650_v21  ;;  %v1649_v23 = vadd.f32 -14.285714, %v2416_v59 }
 0x22c   : > { %1816 = vpow2.f32 %v953_v29  ;;  %v1058_v45 = vadd.f32 %v1815_v39, %v1813_v37 }
 0x22d   : > { %1818 = vpow2.f32 %v955_v31 }
 0x22e   : > { %1011 = vadd.xlane.f32.xlu2 %v1010_v34  ;;  %1014 = vadd.xlane.f32.xlu1 %v1013_v36  ;;  %1820 = vpow2.f32 %v893_v33  ;;  %v720_v33 = vpop.f32.mrf.mxu1  ;;  %v915_v36 = vmul.f32 1.442695, %v1651_v25 }
 0x22f   : > { %v631_v7 = vpop.f32.mrf.mxu2  ;;  %v744_v41 = vpop.f32.mrf.mxu3  ;;  %1822 = vpow2.f32 %v895_v6 }
 0x230   : > { %v1672_v42 = vadd.f32 -14.285714, %v631_v7  ;;  %v1673_v10 = vadd.f32 -14.285714, %v744_v41  ;;  %1824 = vpow2.f32 %v897_v38  ;;  %v1655_v7 = vadd.f32 -14.285714, %v717_v11 }
 0x231   : > { %1826 = vpow2.f32 %v899_v40  ;;  %v1654_v40 = vadd.f32 -14.285714, %v604_v1  ;;  %v909_v41 = vmul.f32 1.442695, %v1648_v18 }
 0x232   : > { %v1817_v43 = vpop.eup %1816  ;;  %v957_v47 = vmul.f32 1.442695, %v1672_v42  ;;  %v959_v49 = vmul.f32 1.442695, %v1673_v10  ;;  %v923_v54 = vmul.f32 1.442695, %v1655_v7 }
 0x233   : > { %v1819_v46 = vpop.eup %1818 }
 0x234   : > { %v1061_v48 = vadd.f32 %v1819_v46, %v1817_v43  ;;  %v1821_v50 = vpop.eup %1820  ;;  %1828 = vpow2.f32 %v957_v47  ;;  %v911_v43 = vmul.f32 1.442695, %v1649_v23  ;;  %v921_v46 = vmul.f32 1.442695, %v1654_v40  ;;  %v610_v47 = vpop.f32.mrf.mxu0 }
 0x235   : > { %v1823_v51 = vpop.eup %1822  ;;  %1830 = vpow2.f32 %v959_v49  ;;  %v1658_v56 = vadd.f32 -14.285714, %v610_v47 }
 0x236   : > { %1059 = vadd.xlane.f32.xlu2 %v1058_v45  ;;  %1062 = vadd.xlane.f32.xlu1 %v1061_v48  ;;  %v1825_v55 = vpop.eup %1824  ;;  %v1016_v12 = vadd.f32 %v1823_v51, %v1821_v50  ;;  %v1652_v51 = vadd.f32 -14.285714, %v2426_v9 }
 0x237   : > { %v634_v52 = vpop.f32.mrf.mxu2  ;;  %v747_v53 = vpop.f32.mrf.mxu3 }
 0x238   : > { %v1674_v57 = vadd.f32 -14.285714, %v634_v52  ;;  %v1675_v58 = vadd.f32 -14.285714, %v747_v53  ;;  %v1827_v61 = vpop.eup %1826  ;;  %v723_v52 = vpop.f32.mrf.mxu1 }
 0x239   : > { %v1019_v13 = vadd.f32 %v1827_v61, %v1825_v55  ;;  %v1653_v55 = vadd.f32 -14.285714, %v2428_v44  ;;  %v917_v61 = vmul.f32 1.442695, %v1652_v51 }
 0x23a   : > { %v961_v3 = vmul.f32 1.442695, %v1674_v57  ;;  %v963_v4 = vmul.f32 1.442695, %v1675_v58  ;;  %v1829_v14 = vpop.eup %1828  ;;  %v1659_v58 = vadd.f32 -14.285714, %v723_v52 }
 0x23b   : > { %v1831_v20 = vpop.eup %1830  ;;  %v919_v63 = vmul.f32 1.442695, %v1653_v55 }
 0x23c   : > { %1832 = vpow2.f32 %v961_v3  ;;  %v1064_v22 = vadd.f32 %v1831_v20, %v1829_v14  ;;  %v929_v3 = vmul.f32 1.442695, %v1658_v56  ;;  %v931_v5 = vmul.f32 1.442695, %v1659_v58 }
 0x23d   : > { %1834 = vpow2.f32 %v963_v4 }
 0x23e   : > { %1017 = vadd.xlane.f32.xlu2 %v1016_v12  ;;  %1020 = vadd.xlane.f32.xlu1 %v1019_v13  ;;  %1836 = vpow2.f32 %v901_v8  ;;  %v1656_v12 = vadd.f32 -14.285714, %v607_v26  ;;  %v1657_v13 = vadd.f32 -14.285714, %v720_v33 }
 0x23f   : > { %v637_v19 = vpop.f32.mrf.mxu2  ;;  %v750_v30 = vpop.f32.mrf.mxu3  ;;  %1838 = vpow2.f32 %v903_v16 }
 0x240   : > { %v1676_v0 = vadd.f32 -14.285714, %v637_v19  ;;  %v1677_v2 = vadd.f32 -14.285714, %v750_v30  ;;  %1840 = vpow2.f32 %v905_v15  ;;  %v925_v15 = vmul.f32 1.442695, %v1656_v12  ;;  %v613_v30 = vpop.f32.mrf.mxu0 }
 0x241   : > { %1842 = vpow2.f32 %v907_v17  ;;  %v927_v19 = vmul.f32 1.442695, %v1657_v13 }
 0x242   : > { %v1833_v35 = vpop.eup %1832  ;;  %v965_v28 = vmul.f32 1.442695, %v1676_v0  ;;  %v967_v29 = vmul.f32 1.442695, %v1677_v2  ;;  %v726_v2 = vpop.f32.mrf.mxu1 }
 0x243   : > { %v1835_v24 = vpop.eup %1834 }
 0x244   : > { %v1067_v27 = vadd.f32 %v1835_v24, %v1833_v35  ;;  %v1837_v31 = vpop.eup %1836  ;;  %1844 = vpow2.f32 %v965_v28 }
 0x245   : > { %v1839_v34 = vpop.eup %1838  ;;  %1846 = vpow2.f32 %v967_v29  ;;  %v1661_v29 = vadd.f32 -14.285714, %v726_v2 }
 0x246   : > { %1065 = vadd.xlane.f32.xlu2 %v1064_v22  ;;  %1068 = vadd.xlane.f32.xlu1 %v1067_v27  ;;  %v1841_v38 = vpop.eup %1840  ;;  %1848 = vpow2.f32 %v913_v32  ;;  %v1022_v42 = vadd.f32 %v1839_v34, %v1837_v31  ;;  %v1660_v27 = vadd.f32 -14.285714, %v613_v30 }
 0x247   : > { %v640_v6 = vpop.f32.mrf.mxu2  ;;  %v753_v37 = vpop.f32.mrf.mxu3  ;;  %1850 = vpow2.f32 %v915_v36 }
 0x248   : > { %v1843_v39 = vpop.eup %1842  ;;  %1852 = vpow2.f32 %v909_v41  ;;  %v1678_v16 = vadd.f32 -14.285714, %v640_v6  ;;  %v1679_v14 = vadd.f32 -14.285714, %v753_v37  ;;  %v933_v33 = vmul.f32 1.442695, %v1660_v27 }
 0x249   : > { %v1025_v10 = vadd.f32 %v1843_v39, %v1841_v38  ;;  %1854 = vpow2.f32 %v911_v43  ;;  %v935_v6 = vmul.f32 1.442695, %v1661_v29 }
 0x24a   : > { %v1845_v45 = vpop.eup %1844  ;;  %1856 = vpow2.f32 %v921_v46  ;;  %v969_v35 = vmul.f32 1.442695, %v1678_v16  ;;  %v971_v22 = vmul.f32 1.442695, %v1679_v14 }
 0x24b   : > { %v1847_v48 = vpop.eup %1846  ;;  %1858 = vpow2.f32 %v923_v54 }
 0x24c   : > { %v1849_v59 = vpop.eup %1848  ;;  %v1070_v57 = vadd.f32 %v1847_v48, %v1845_v45  ;;  %1860 = vpow2.f32 %v917_v61 }
 0x24d   : > { %v1851_v53 = vpop.eup %1850  ;;  %1862 = vpow2.f32 %v919_v63 }
 0x24e   : > { %1023 = vadd.xlane.f32.xlu2 %v1022_v42  ;;  %1026 = vadd.xlane.f32.xlu1 %v1025_v10  ;;  %v1031_v62 = vadd.f32 %v1851_v53, %v1849_v59  ;;  %v1853_v1 = vpop.eup %1852  ;;  %1864 = vpow2.f32 %v929_v3 }
 0x24f   : > { %v2438_v49 = vpop.f32.mrf.mxu2  ;;  %v2440_v50 = vpop.f32.mrf.mxu3  ;;  %1866 = vpow2.f32 %v931_v5 }
 0x250   : > { %v1855_v4 = vpop.eup %1854  ;;  %1868 = vpow2.f32 %v925_v15  ;;  %v1680_v43 = vadd.f32 -14.285714, %v2438_v49  ;;  %v1681_v45 = vadd.f32 -14.285714, %v2440_v50 }
 0x251   : > { %v1857_v11 = vpop.eup %1856  ;;  %v1028_v20 = vadd.f32 %v1855_v4, %v1853_v1  ;;  %1870 = vpow2.f32 %v927_v19 }
 0x252   : > { %v1859_v44 = vpop.eup %1858  ;;  %1872 = vpow2.f32 %v969_v35  ;;  %v973_v51 = vmul.f32 1.442695, %v1680_v43  ;;  %v975_v53 = vmul.f32 1.442695, %v1681_v45  ;;  %v795_v43 = vld [vmem:[#allocation2 + $0x90] sm:$0xff] }
 0x253   : > { %v1037_v17 = vadd.f32 %v1859_v44, %v1857_v11  ;;  %v1861_v0 = vpop.eup %1860  ;;  %1874 = vpow2.f32 %v971_v22  ;;  %v779_v45 = vld [vmem:[#allocation2 + $0x10] sm:$0xff] }
 0x254   : > { %v1863_v21 = vpop.eup %1862  ;;  %1876 = vpow2.f32 %v933_v33 }
 0x255   : > { %v1865_v26 = vpop.eup %1864  ;;  %v1034_v34 = vadd.f32 %v1863_v21, %v1861_v0  ;;  %1878 = vpow2.f32 %v935_v6 }
 0x256   : > { %1071 = vadd.xlane.f32.xlu2 %v1070_v57  ;;  %1032 = vadd.xlane.f32.xlu1 %v1031_v62  ;;  %v1867_v28 = vpop.eup %1866 }
 0x257   : > { %v646_v9 = vpop.f32.mrf.mxu2  ;;  %v759_v8 = vpop.f32.mrf.mxu3  ;;  %v1043_v36 = vadd.f32 %v1867_v28, %v1865_v26 }
 0x258   : > { %v1682_v31 = vadd.f32 -14.285714, %v646_v9  ;;  %v1683_v32 = vadd.f32 -14.285714, %v759_v8  ;;  %v1869_v37 = vpop.eup %1868 }
 0x259   : > { %v1871_v18 = vpop.eup %1870 }
 0x25a   : > { %v977_v38 = vmul.f32 1.442695, %v1682_v31  ;;  %v979_v39 = vmul.f32 1.442695, %v1683_v32  ;;  %v1873_v7 = vpop.eup %1872  ;;  %v1040_v46 = vadd.f32 %v1871_v18, %v1869_v37  ;;  %v793_v32 = vld [vmem:[#allocation2 + $0x80] sm:$0xff] }
 0x25b   : > { %v1875_v42 = vpop.eup %1874 }
 0x25c   : > { %1880 = vpow2.f32 %v977_v38  ;;  %v1073_v47 = vadd.f32 %v1875_v42, %v1873_v7  ;;  %v1877_v59 = vpop.eup %1876 }
 0x25d   : > { %1882 = vpow2.f32 %v979_v39  ;;  %v1879_v52 = vpop.eup %1878  ;;  %v794_v39 = vld [vmem:[#allocation2 + $0x88] sm:$0xff] }
 0x25e   : > { %1029 = vadd.xlane.f32.xlu2 %v1028_v20  ;;  %1038 = vadd.xlane.f32.xlu1 %v1037_v17  ;;  %v1046_v62 = vadd.f32 %v1879_v52, %v1877_v59  ;;  %v780_v59 = vld [vmem:[#allocation2 + $0x18] sm:$0xff] }
 0x25f   : > { %v649_v24 = vpop.f32.mrf.mxu2  ;;  %v762_v25 = vpop.f32.mrf.mxu3 }
 0x260   : > { %v1684_v49 = vadd.f32 -14.285714, %v649_v24  ;;  %v1685_v50 = vadd.f32 -14.285714, %v762_v25 }
 0x262   : > { %v1881_v57 = vpop.eup %1880  ;;  %v981_v63 = vmul.f32 1.442695, %v1684_v49  ;;  %v983_v4 = vmul.f32 1.442695, %v1685_v50 }
 0x263   : > { %v1883_v58 = vpop.eup %1882 }
 0x264   : > { %v1079_v61 = vadd.f32 %v1883_v58, %v1881_v57  ;;  %v796_v57 = vld [vmem:[#allocation2 + $0x98] sm:$0xff]  ;;  %v797_v58 = vld [vmem:[#allocation2 + $0xa0] sm:$0xff] }
 0x266   : > { %1035 = vadd.xlane.f32.xlu2 %v1034_v34  ;;  %1044 = vadd.xlane.f32.xlu1 %v1043_v36 }
 0x267   : > { %v652_v23 = vpop.f32.mrf.mxu2  ;;  %v765_v40 = vpop.f32.mrf.mxu3 }
 0x268   : > { %v1686_v41 = vadd.f32 -14.285714, %v652_v23  ;;  %v1687_v10 = vadd.f32 -14.285714, %v765_v40  ;;  %v778_v23 = vld [vmem:[#allocation2 + $0x8] sm:$0xff] }
 0x26a   : > { %v985_v48 = vmul.f32 1.442695, %v1686_v41  ;;  %v987_v54 = vmul.f32 1.442695, %v1687_v10 }
 0x26c   : > { %1884 = vpow2.f32 %v985_v48 }
 0x26d   : > { %1886 = vpow2.f32 %v987_v54 }
 0x26e   : > { %1041 = vadd.xlane.f32.xlu2 %v1040_v46  ;;  %1074 = vadd.xlane.f32.xlu1 %v1073_v47  ;;  %1888 = vpow2.f32 %v973_v51  ;;  %v781_v51 = vld [vmem:[#allocation2 + $0x20] sm:$0xff] }
 0x26f   : > { %v655_v55 = vpop.f32.mrf.mxu2  ;;  %v768_v56 = vpop.f32.mrf.mxu3  ;;  %1890 = vpow2.f32 %v975_v53 }
 0x270   : > { %1892 = vpow2.f32 %v981_v63  ;;  %v1688_v13 = vadd.f32 -14.285714, %v655_v55  ;;  %v1689_v20 = vadd.f32 -14.285714, %v768_v56  ;;  %v782_v63 = vld [vmem:[#allocation2 + $0x28] sm:$0xff] }
 0x271   : > { %1894 = vpow2.f32 %v983_v4 }
 0x272   : > { %v1885_v1 = vpop.eup %1884  ;;  %v989_v19 = vmul.f32 1.442695, %v1688_v13  ;;  %v991_v0 = vmul.f32 1.442695, %v1689_v20  ;;  %v1193_v20 = vld [vmem:[#allocation2] sm:$0xff] }
 0x273   : > { %v1887_v3 = vpop.eup %1886 }
 0x274   : > { %v1889_v8 = vpop.eup %1888  ;;  %v1085_v16 = vadd.f32 %v1887_v3, %v1885_v1  ;;  %v783_v1 = vld [vmem:[#allocation2 + $0x30] sm:$0xff] }
 0x275   : > { %v1891_v44 = vpop.eup %1890 }
 0x276   : > { %1080 = vadd.xlane.f32.xlu1 %v1079_v61  ;;  %1047 = vadd.xlane.f32.xlu2 %v1046_v62  ;;  %v1076_v17 = vadd.f32 %v1891_v44, %v1889_v8  ;;  %v1893_v30 = vpop.eup %1892  ;;  %v798_v8 = vld [vmem:[#allocation2 + $0xa8] sm:$0xff] }
 0x277   : > { %v658_v5 = vpop.f32.mrf.mxu2  ;;  %v771_v9 = vpop.f32.mrf.mxu3 }
 0x278   : > { %v1690_v11 = vadd.f32 -14.285714, %v658_v5  ;;  %v1691_v12 = vadd.f32 -14.285714, %v771_v9  ;;  %v1895_v22 = vpop.eup %1894 }
 0x279   : > { %v1082_v27 = vadd.f32 %v1895_v22, %v1893_v30 }
 0x27a   : > { %v993_v14 = vmul.f32 1.442695, %v1690_v11  ;;  %v995_v15 = vmul.f32 1.442695, %v1691_v12  ;;  %v799_v11 = vld [vmem:[#allocation2 + $0xb0] sm:$0xff] }
 0x27c   : > { %1896 = vpow2.f32 %v993_v14  ;;  %v1170_v14 = vld.sshfl [vmem:[#allocation1] sm:$0xff pattern:$0x75316420] }
 0x27d   : > { %1898 = vpow2.f32 %v995_v15  ;;  %v1171_v15 = vld.sshfl [vmem:[#allocation1 + $0x8] sm:$0xff pattern:$0x75316420]  ;;  %v1174_v30 = vsel %vm280_vm0, %v1170_v14, 0.0 }
 0x27e   : > { %1086 = vadd.xlane.f32.xlu1 %v1085_v16  ;;  %1077 = vadd.xlane.f32.xlu2 %v1076_v17  ;;  %1900 = vpow2.f32 %v989_v19  ;;  %v784_v17 = vld [vmem:[#allocation2 + $0x38] sm:$0xff]  ;;  %v785_v19 = vld [vmem:[#allocation2 + $0x40] sm:$0xff] }
 0x27f   : > { %v661_v2 = vpop.f32.mrf.mxu2  ;;  %v774_v35 = vpop.f32.mrf.mxu3  ;;  %1902 = vpow2.f32 %v991_v0  ;;  %v1175_v0 = vsel %vm280_vm0, %v1171_v15, 0.0 }
 0x280   : > { %v1692_v21 = vadd.f32 -14.285714, %v661_v2  ;;  %v1693_v24 = vadd.f32 -14.285714, %v774_v35  ;;  %v1176_v35 = vadd.f32 %v1175_v0, %v1174_v30 }
 0x282   : > { %v1897_v25 = vpop.eup %1896  ;;  %v997_v28 = vmul.f32 1.442695, %v1692_v21  ;;  %v999_v31 = vmul.f32 1.442695, %v1693_v24 }
 0x283   : > { %v1899_v26 = vpop.eup %1898 }
 0x284   : > { %v1091_v29 = vadd.f32 %v1899_v26, %v1897_v25  ;;  %v1901_v33 = vpop.eup %1900  ;;  %1904 = vpow2.f32 %v997_v28  ;;  %v1225_v25 = vmax.f32 %v1193_v20, 1e-30 }
 0x285   : > { %v1903_v34 = vpop.eup %1902  ;;  %1906 = vpow2.f32 %v999_v31 }
 0x286   : > { %1083 = vadd.xlane.f32.xlu2 %v1082_v27  ;;  %1092 = vadd.xlane.f32.xlu1 %v1091_v29  ;;  %v1088_v37 = vadd.f32 %v1903_v34, %v1901_v33  ;;  %1908 = vlog2.f32 %v1225_v25  ;;  %v800_v33 = vld [vmem:[#allocation2 + $0xb8] sm:$0xff]  ;;  %v787_v34 = vld [vmem:[#allocation2 + $0x50] sm:$0xff] }
 0x289   : > { %v1051_v36 = vpop.xlane.xlu1 %1050 }
 0x28a   : > { %v1113_v6 = vadd.f32 %v1051_v36, %v793_v32  ;;  %v1905_v38 = vpop.eup %1904 }
 0x28b   : > { %v1907_v18 = vpop.eup %1906 }
 0x28c   : > { %1146 = vst.msk [vmem:[#allocation2 + $0x80] sm:$0xff] %vm236_vm14, %v1113_v6  ;;  %v1094_v10 = vadd.f32 %v1907_v18, %v1905_v38 }
 0x28e   : > { %1089 = vadd.xlane.f32.xlu2 %v1088_v37  ;;  %1177 = vadd.xlane.f32.xlu1 %v1176_v35 }
 0x291   : > { %v1054_v40 = vpop.xlane.xlu2 %1053  ;;  %v1006_v7 = vpop.xlane.xlu1 %1005 }
 0x292   : > { %v1114_v41 = vadd.f32 %v1054_v40, %v794_v39  ;;  %v1098_v42 = vadd.f32 %v1006_v7, %v778_v23  ;;  %v1909_v23 = vpop.eup %1908 }
 0x294   : > { %1147 = vst.msk [vmem:[#allocation2 + $0x88] sm:$0xff] %vm236_vm14, %v1114_v41 }
 0x295   : > { %1131 = vst.msk [vmem:[#allocation2 + $0x8] sm:$0xff] %vm236_vm14, %v1098_v42 }
 0x296   : > { %1095 = vadd.xlane.f32.xlu2 %v1094_v10 }
 0x299   : > { %v1057_v46 = vpop.xlane.xlu1 %1056  ;;  %v1009_v47 = vpop.xlane.xlu2 %1008 }
 0x29a   : > { %v1115_v48 = vadd.f32 %v1057_v46, %v795_v43  ;;  %v1099_v54 = vadd.f32 %v1009_v47, %v779_v45  ;;  %v786_v43 = vld [vmem:[#allocation2 + $0x48] sm:$0xff]  ;;  %v789_v45 = vld [vmem:[#allocation2 + $0x60] sm:$0xff] }
 0x29c   : > { %1148 = vst.msk [vmem:[#allocation2 + $0x90] sm:$0xff] %vm236_vm14, %v1115_v48  ;;  %v1194_v2 = vld [vmem:[#allocation2 + $0x8] sm:$0xff] }
 0x29d   : > { %1132 = vst.msk [vmem:[#allocation2 + $0x10] sm:$0xff] %vm236_vm14, %v1099_v54  ;;  %v1226_v28 = vmax.f32 %v1194_v2, 1e-30  ;;  %v1258_v54 = vmul.f32 0.6931472, %v1909_v23 }
 0x29f   : > { %1910 = vlog2.f32 %v1226_v28 }
 0x2a1   : > { %v1012_v52 = vpop.xlane.xlu2 %1011  ;;  %v1015_v53 = vpop.xlane.xlu1 %1014 }
 0x2a2   : > { %v1100_v55 = vadd.f32 %v1012_v52, %v780_v59  ;;  %v1101_v56 = vadd.f32 %v1015_v53, %v781_v51 }
 0x2a4   : > { %1133 = vst.msk [vmem:[#allocation2 + $0x18] sm:$0xff] %vm236_vm14, %v1100_v55  ;;  %v1195_v21 = vld [vmem:[#allocation2 + $0x10] sm:$0xff] }
 0x2a5   : > { %1134 = vst.msk [vmem:[#allocation2 + $0x20] sm:$0xff] %vm236_vm14, %v1101_v56  ;;  %v1227_v29 = vmax.f32 %v1195_v21, 1e-30  ;;  %v1911_v7 = vpop.eup %1910 }
 0x2a6   : > { %v1260_v46 = vmul.f32 0.6931472, %v1911_v7 }
 0x2a7   : > { %1912 = vlog2.f32 %v1227_v29  ;;  %v790_v29 = vld [vmem:[#allocation2 + $0x68] sm:$0xff] }
 0x2a9   : > { %v1060_v49 = vpop.xlane.xlu2 %1059  ;;  %v1063_v50 = vpop.xlane.xlu1 %1062 }
 0x2aa   : > { %v1116_v61 = vadd.f32 %v1060_v49, %v796_v57  ;;  %v1117_v62 = vadd.f32 %v1063_v50, %v797_v58  ;;  %v1322_v58 = vadd.f32 14.285714, %v1260_v46  ;;  %v1321_v50 = vadd.f32 14.285714, %v1258_v54  ;;  %v792_v54 = vld [vmem:[#allocation2 + $0x78] sm:$0xff] }
 0x2ab   : > { %v1196_v31 = vld [vmem:[#allocation2 + $0x18] sm:$0xff] }
 0x2ac   : > { %1149 = vst.msk [vmem:[#allocation2 + $0x98] sm:$0xff] %vm236_vm14, %v1116_v61  ;;  %v1228_v32 = vmax.f32 %v1196_v31, 1e-30  ;;  %v1197_v36 = vld [vmem:[#allocation2 + $0x20] sm:$0xff] }
 0x2ad   : > { %1150 = vst.msk [vmem:[#allocation2 + $0xa0] sm:$0xff] %vm236_vm14, %v1117_v62  ;;  %v1229_v40 = vmax.f32 %v1197_v36, 1e-30  ;;  %v1913_v42 = vpop.eup %1912  ;;  %v801_v31 = vld [vmem:[#allocation2 + $0xc0] sm:$0xff] }
 0x2ae   : > { %1914 = vlog2.f32 %v1228_v32  ;;  %v1262_v59 = vmul.f32 0.6931472, %v1913_v42 }
 0x2af   : > { %1916 = vlog2.f32 %v1229_v40 }
 0x2b0   : > { %v1323_v61 = vadd.f32 14.285714, %v1262_v59 }
 0x2b1   : > { %v1018_v3 = vpop.xlane.xlu2 %1017  ;;  %v1021_v4 = vpop.xlane.xlu1 %1020 }
 0x2b2   : > { %v1102_v5 = vadd.f32 %v1018_v3, %v782_v63  ;;  %v1103_v9 = vadd.f32 %v1021_v4, %v783_v1  ;;  %v788_v3 = vld [vmem:[#allocation2 + $0x58] sm:$0xff]  ;;  %v791_v4 = vld [vmem:[#allocation2 + $0x70] sm:$0xff] }
 0x2b4   : > { %1135 = vst.msk [vmem:[#allocation2 + $0x28] sm:$0xff] %vm236_vm14, %v1102_v5  ;;  %v1915_v48 = vpop.eup %1914  ;;  %v1354_v5 = vsel %vm236_vm14, %v1322_v58, 0.0 }
 0x2b5   : > { %1136 = vst.msk [vmem:[#allocation2 + $0x30] sm:$0xff] %vm236_vm14, %v1103_v9  ;;  %v1264_v49 = vmul.f32 0.6931472, %v1915_v48  ;;  %v1917_v62 = vpop.eup %1916  ;;  %v803_v48 = vld [vmem:[#allocation2 + $0xd0] sm:$0xff] }
 0x2b7   : > { %v1324_v9 = vadd.f32 14.285714, %v1264_v49 }
 0x2b9   : > { %v1066_v12 = vpop.xlane.xlu2 %1065  ;;  %v1069_v44 = vpop.xlane.xlu1 %1068  ;;  %v1358_v0 = vsel %vm236_vm14, %v1324_v9, 0.0 }
 0x2ba   : > { %v1118_v13 = vadd.f32 %v1066_v12, %v798_v8  ;;  %v1119_v16 = vadd.f32 %v1069_v44, %v799_v11  ;;  %v1353_v8 = vsel %vm236_vm14, %v1321_v50, 0.0  ;;  %v1356_v11 = vsel %vm236_vm14, %v1323_v61, 0.0 }
 0x2bb   : > { %v1198_v38 = vld [vmem:[#allocation2 + $0x28] sm:$0xff] }
 0x2bc   : > { %1151 = vst.msk [vmem:[#allocation2 + $0xa8] sm:$0xff] %vm236_vm14, %v1118_v13  ;;  %v1230_v41 = vmax.f32 %v1198_v38, 1e-30  ;;  %v1199_v10 = vld [vmem:[#allocation2 + $0x30] sm:$0xff] }
 0x2bd   : > { %1152 = vst.msk [vmem:[#allocation2 + $0xb0] sm:$0xff] %vm236_vm14, %v1119_v16  ;;  %v1231_v53 = vmax.f32 %v1199_v10, 1e-30  ;;  %v1266_v16 = vmul.f32 0.6931472, %v1917_v62  ;;  %v1209_v62 = vld [vmem:[#allocation2 + $0x80] sm:$0xff] }
 0x2be   : > { %1918 = vlog2.f32 %v1230_v41 }
 0x2bf   : > { %1920 = vlog2.f32 %v1231_v53 }
 0x2c1   : > { %v1024_v22 = vpop.xlane.xlu2 %1023  ;;  %v1027_v24 = vpop.xlane.xlu1 %1026 }
 0x2c2   : > { %v1104_v26 = vadd.f32 %v1024_v22, %v784_v17  ;;  %v1105_v27 = vadd.f32 %v1027_v24, %v785_v19  ;;  %v1355_v17 = vadd.f32 %v1354_v5, %v1353_v8  ;;  %v1325_v24 = vadd.f32 14.285714, %v1266_v16 }
 0x2c4   : > { %1137 = vst.msk [vmem:[#allocation2 + $0x38] sm:$0xff] %vm236_vm14, %v1104_v26  ;;  %v1919_v1 = vpop.eup %1918  ;;  %v1357_v22 = vadd.f32 %v1356_v11, %v1355_v17  ;;  %v1360_v36 = vsel %vm236_vm14, %v1325_v24, 0.0  ;;  %v1210_v11 = vld [vmem:[#allocation2 + $0x88] sm:$0xff]  ;;  %v1211_v17 = vld [vmem:[#allocation2 + $0x90] sm:$0xff] }
 0x2c5   : > { %1138 = vst.msk [vmem:[#allocation2 + $0x40] sm:$0xff] %vm236_vm14, %v1105_v27  ;;  %v1268_v14 = vmul.f32 0.6931472, %v1919_v1  ;;  %v1921_v30 = vpop.eup %1920 }
 0x2c6   : > { %v1359_v26 = vadd.f32 %v1358_v0, %v1357_v22  ;;  %v1270_v27 = vmul.f32 0.6931472, %v1921_v30  ;;  %v1242_v0 = vmax.f32 %v1210_v11, 1e-30  ;;  %v806_v11 = vld [vmem:[#allocation2 + $0xe8] sm:$0xff] }
 0x2c7   : > { %v1326_v25 = vadd.f32 14.285714, %v1268_v14 }
 0x2c8   : > { %v1361_v23 = vadd.f32 %v1360_v36, %v1359_v26  ;;  %v1327_v40 = vadd.f32 14.285714, %v1270_v27  ;;  %v1243_v27 = vmax.f32 %v1211_v17, 1e-30 }
 0x2c9   : > { %v1072_v6 = vpop.xlane.xlu2 %1071  ;;  %v1033_v37 = vpop.xlane.xlu1 %1032 }
 0x2ca   : > { %v1120_v18 = vadd.f32 %v1072_v6, %v800_v33  ;;  %v1107_v39 = vadd.f32 %v1033_v37, %v787_v34  ;;  %v1362_v6 = vsel %vm236_vm14, %v1326_v25, 0.0  ;;  %v1364_v59 = vsel %vm236_vm14, %v1327_v40, 0.0  ;;  %v804_v40 = vld [vmem:[#allocation2 + $0xd8] sm:$0xff] }
 0x2cb   : > { %v1200_v47 = vld [vmem:[#allocation2 + $0x38] sm:$0xff] }
 0x2cc   : > { %1153 = vst.msk [vmem:[#allocation2 + $0xb8] sm:$0xff] %vm236_vm14, %v1120_v18  ;;  %v1232_v57 = vmax.f32 %v1200_v47, 1e-30  ;;  %v1201_v63 = vld [vmem:[#allocation2 + $0x40] sm:$0xff] }
 0x2cd   : > { %1140 = vst.msk [vmem:[#allocation2 + $0x50] sm:$0xff] %vm236_vm14, %v1107_v39  ;;  %v1233_v12 = vmax.f32 %v1201_v63, 1e-30 }
 0x2ce   : > { %1922 = vlog2.f32 %v1232_v57 }
 0x2cf   : > { %1924 = vlog2.f32 %v1233_v12  ;;  %v1241_v12 = vmax.f32 %v1209_v62, 1e-30 }
 0x2d1   : > { %v1030_v51 = vpop.xlane.xlu2 %1029  ;;  %v1039_v52 = vpop.xlane.xlu1 %1038 }
 0x2d2   : > { %v1106_v55 = vadd.f32 %v1030_v51, %v786_v43  ;;  %v1109_v56 = vadd.f32 %v1039_v52, %v789_v45  ;;  %v1363_v43 = vadd.f32 %v1362_v6, %v1361_v23 }
 0x2d4   : > { %1139 = vst.msk [vmem:[#allocation2 + $0x48] sm:$0xff] %vm236_vm14, %v1106_v55  ;;  %v1203_v2 = vld [vmem:[#allocation2 + $0x50] sm:$0xff]  ;;  %v1923_v21 = vpop.eup %1922  ;;  %v1365_v55 = vadd.f32 %v1364_v59, %v1363_v43 }
 0x2d5   : > { %1142 = vst.msk [vmem:[#allocation2 + $0x60] sm:$0xff] %vm236_vm14, %v1109_v56  ;;  %v1235_v28 = vmax.f32 %v1203_v2, 1e-30  ;;  %v1272_v32 = vmul.f32 0.6931472, %v1923_v21  ;;  %v1925_v39 = vpop.eup %1924  ;;  %v1212_v21 = vld [vmem:[#allocation2 + $0x98] sm:$0xff] }
 0x2d6   : > { %v1274_v46 = vmul.f32 0.6931472, %v1925_v39  ;;  %v1215_v43 = vld [vmem:[#allocation2 + $0xb0] sm:$0xff] }
 0x2d7   : > { %v1328_v42 = vadd.f32 14.285714, %v1272_v32  ;;  %v1244_v32 = vmax.f32 %v1212_v21, 1e-30 }
 0x2d8   : > { %v1329_v58 = vadd.f32 14.285714, %v1274_v46 }
 0x2d9   : > { %v1036_v44 = vpop.xlane.xlu2 %1035  ;;  %v1045_v13 = vpop.xlane.xlu1 %1044  ;;  %v1366_v51 = vsel %vm236_vm14, %v1328_v42, 0.0 }
 0x2da   : > { %v1108_v15 = vadd.f32 %v1036_v44, %v788_v3  ;;  %v1111_v20 = vadd.f32 %v1045_v13, %v791_v4  ;;  %v1367_v63 = vadd.f32 %v1366_v51, %v1365_v55  ;;  %v1368_v44 = vsel %vm236_vm14, %v1329_v58, 0.0 }
 0x2db   : > { %v1202_v19 = vld [vmem:[#allocation2 + $0x48] sm:$0xff] }
 0x2dc   : > { %v1234_v35 = vmax.f32 %v1202_v19, 1e-30  ;;  %1141 = vst.msk [vmem:[#allocation2 + $0x58] sm:$0xff] %vm236_vm14, %v1108_v15  ;;  %v1205_v37 = vld [vmem:[#allocation2 + $0x60] sm:$0xff]  ;;  %v1369_v14 = vadd.f32 %v1368_v44, %v1367_v63 }
 0x2dd   : > { %1144 = vst.msk [vmem:[#allocation2 + $0x70] sm:$0xff] %vm236_vm14, %v1111_v20  ;;  %v1237_v45 = vmax.f32 %v1205_v37, 1e-30  ;;  %v805_v15 = vld [vmem:[#allocation2 + $0xe0] sm:$0xff]  ;;  %v802_v20 = vld [vmem:[#allocation2 + $0xc8] sm:$0xff] }
 0x2de   : > { %1926 = vlog2.f32 %v1234_v35 }
 0x2df   : > { %1928 = vlog2.f32 %v1235_v28  ;;  %v1213_v28 = vld [vmem:[#allocation2 + $0xa0] sm:$0xff] }
 0x2e1   : > { %v1042_v33 = vpop.xlane.xlu2 %1041  ;;  %v1075_v34 = vpop.xlane.xlu1 %1074 }
 0x2e2   : > { %v1110_v38 = vadd.f32 %v1042_v33, %v790_v29  ;;  %v1121_v18 = vadd.f32 %v1075_v34, %v801_v31 }
 0x2e3   : > { %v1204_v7 = vld [vmem:[#allocation2 + $0x58] sm:$0xff] }
 0x2e4   : > { %v1927_v41 = vpop.eup %1926  ;;  %v1236_v10 = vmax.f32 %v1204_v7, 1e-30  ;;  %1143 = vst.msk [vmem:[#allocation2 + $0x68] sm:$0xff] %vm236_vm14, %v1110_v38  ;;  %v1207_v52 = vld [vmem:[#allocation2 + $0x70] sm:$0xff] }
 0x2e5   : > { %1154 = vst.msk [vmem:[#allocation2 + $0xc0] sm:$0xff] %vm236_vm14, %v1121_v18  ;;  %v1276_v47 = vmul.f32 0.6931472, %v1927_v41  ;;  %v1929_v53 = vpop.eup %1928  ;;  %v1239_v1 = vmax.f32 %v1207_v52, 1e-30  ;;  %v1214_v18 = vld [vmem:[#allocation2 + $0xa8] sm:$0xff] }
 0x2e6   : > { %1930 = vlog2.f32 %v1236_v10  ;;  %v1278_v5 = vmul.f32 0.6931472, %v1929_v53  ;;  %v807_v7 = vld [vmem:[#allocation2 + $0xf0] sm:$0xff]  ;;  %v1245_v41 = vmax.f32 %v1213_v28, 1e-30  ;;  %v1216_v52 = vld [vmem:[#allocation2 + $0xb8] sm:$0xff] }
 0x2e7   : > { %1932 = vlog2.f32 %v1237_v45  ;;  %v1330_v49 = vadd.f32 14.285714, %v1276_v47  ;;  %v1248_v63 = vmax.f32 %v1216_v52, 1e-30 }
 0x2e8   : > { %v1331_v19 = vadd.f32 14.285714, %v1278_v5 }
 0x2e9   : > { %v1081_v56 = vpop.xlane.xlu1 %1080  ;;  %v1048_v57 = vpop.xlane.xlu2 %1047  ;;  %v1370_v13 = vsel %vm236_vm14, %v1330_v49, 0.0 }
 0x2ea   : > { %v1123_v50 = vadd.f32 %v1081_v56, %v803_v48  ;;  %v1112_v61 = vadd.f32 %v1048_v57, %v792_v54  ;;  %v1371_v22 = vadd.f32 %v1370_v13, %v1369_v14  ;;  %v1372_v33 = vsel %vm236_vm14, %v1331_v19, 0.0 }
 0x2eb   : > { %v1206_v3 = vld [vmem:[#allocation2 + $0x68] sm:$0xff]  ;;  %v1246_v48 = vmax.f32 %v1214_v18, 1e-30  ;;  %v1247_v57 = vmax.f32 %v1215_v43, 1e-30 }
 0x2ec   : > { %v1931_v4 = vpop.eup %1930  ;;  %v1238_v9 = vmax.f32 %v1206_v3, 1e-30  ;;  %1156 = vst.msk [vmem:[#allocation2 + $0xd0] sm:$0xff] %vm236_vm14, %v1123_v50  ;;  %v1373_v38 = vadd.f32 %v1372_v33, %v1371_v22  ;;  %v1217_v56 = vld [vmem:[#allocation2 + $0xc0] sm:$0xff] }
 0x2ed   : > { %v1280_v8 = vmul.f32 0.6931472, %v1931_v4  ;;  %1145 = vst.msk [vmem:[#allocation2 + $0x78] sm:$0xff] %vm236_vm14, %v1112_v61  ;;  %v1933_v16 = vpop.eup %1932  ;;  %v1249_v5 = vmax.f32 %v1217_v56, 1e-30 }
 0x2ee   : > { %1934 = vlog2.f32 %v1238_v9  ;;  %v1282_v24 = vmul.f32 0.6931472, %v1933_v16 }
 0x2ef   : > { %1936 = vlog2.f32 %v1239_v1  ;;  %v1332_v30 = vadd.f32 14.285714, %v1280_v8 }
 0x2f0   : > { %1938 = vlog2.f32 %v1241_v12  ;;  %v1333_v39 = vadd.f32 14.285714, %v1282_v24 }
 0x2f1   : > { %v1087_v2 = vpop.xlane.xlu1 %1086  ;;  %v1078_v35 = vpop.xlane.xlu2 %1077  ;;  %1940 = vlog2.f32 %v1242_v0  ;;  %v1374_v34 = vsel %vm236_vm14, %v1332_v30, 0.0 }
 0x2f2   : > { %v1125_v25 = vadd.f32 %v1087_v2, %v805_v15  ;;  %v1122_v26 = vadd.f32 %v1078_v35, %v802_v20  ;;  %1942 = vlog2.f32 %v1243_v27  ;;  %v1375_v10 = vadd.f32 %v1374_v34, %v1373_v38  ;;  %v808_v38 = vld [vmem:[#allocation2 + $0xf8] sm:$0xff] }
 0x2f3   : > { %v1376_v53 = vsel %vm236_vm14, %v1333_v39, 0.0  ;;  %v1219_v44 = vld [vmem:[#allocation2 + $0xd0] sm:$0xff] }
 0x2f4   : > { %v1935_v29 = vpop.eup %1934  ;;  %1158 = vst.msk [vmem:[#allocation2 + $0xe0] sm:$0xff] %vm236_vm14, %v1125_v25  ;;  %v1208_v31 = vld [vmem:[#allocation2 + $0x78] sm:$0xff]  ;;  %v1377_v49 = vadd.f32 %v1376_v53, %v1375_v10  ;;  %v1251_v24 = vmax.f32 %v1219_v44, 1e-30 }
 0x2f5   : > { %v1937_v36 = vpop.eup %1936  ;;  %1155 = vst.msk [vmem:[#allocation2 + $0xc8] sm:$0xff] %vm236_vm14, %v1122_v26  ;;  %v1240_v6 = vmax.f32 %v1208_v31, 1e-30  ;;  %v1284_v37 = vmul.f32 0.6931472, %v1935_v29 }
 0x2f6   : > { %v1939_v23 = vpop.eup %1938  ;;  %v1286_v45 = vmul.f32 0.6931472, %v1937_v36 }
 0x2f7   : > { %1944 = vlog2.f32 %v1240_v6  ;;  %v1334_v42 = vadd.f32 14.285714, %v1284_v37  ;;  %v1941_v54 = vpop.eup %1940  ;;  %v1290_v58 = vmul.f32 0.6931472, %v1939_v23 }
 0x2f8   : > { %1946 = vlog2.f32 %v1244_v32  ;;  %v1943_v50 = vpop.eup %1942  ;;  %v1335_v61 = vadd.f32 14.285714, %v1286_v45  ;;  %v1292_v1 = vmul.f32 0.6931472, %v1941_v54 }
 0x2f9   : > { %v1084_v46 = vpop.xlane.xlu2 %1083  ;;  %v1093_v47 = vpop.xlane.xlu1 %1092  ;;  %v1378_v55 = vsel %vm236_vm14, %v1334_v42, 0.0  ;;  %1948 = vlog2.f32 %v1245_v41  ;;  %v1337_v12 = vadd.f32 14.285714, %v1290_v58  ;;  %v1294_v13 = vmul.f32 0.6931472, %v1943_v50 }
 0x2fa   : > { %v1124_v59 = vadd.f32 %v1084_v46, %v804_v40  ;;  %v1127_v51 = vadd.f32 %v1093_v47, %v807_v7  ;;  %1950 = vlog2.f32 %v1246_v48  ;;  %v1379_v3 = vadd.f32 %v1378_v55, %v1377_v49 }
 0x2fb   : > { %1952 = vlog2.f32 %v1247_v57  ;;  %v1380_v14 = vsel %vm236_vm14, %v1335_v61, 0.0  ;;  %v1338_v19 = vadd.f32 14.285714, %v1292_v1  ;;  %v1384_v26 = vsel %vm236_vm14, %v1337_v12, 0.0  ;;  %v1221_v27 = vld [vmem:[#allocation2 + $0xe0] sm:$0xff] }
 0x2fc   : > { %1157 = vst.msk [vmem:[#allocation2 + $0xd8] sm:$0xff] %vm236_vm14, %v1124_v59  ;;  %v1218_v4 = vld [vmem:[#allocation2 + $0xc8] sm:$0xff]  ;;  %1954 = vlog2.f32 %v1248_v63  ;;  %v1381_v30 = vadd.f32 %v1380_v14, %v1379_v3  ;;  %v1339_v29 = vadd.f32 14.285714, %v1294_v13  ;;  %v1253_v18 = vmax.f32 %v1221_v27, 1e-30 }
 0x2fd   : > { %v1945_v62 = vpop.eup %1944  ;;  %1160 = vst.msk [vmem:[#allocation2 + $0xf0] sm:$0xff] %vm236_vm14, %v1127_v51  ;;  %v1250_v17 = vmax.f32 %v1218_v4, 1e-30  ;;  %1956 = vlog2.f32 %v1249_v5  ;;  %v1386_v6 = vsel %vm236_vm14, %v1338_v19, 0.0 }
 0x2fe   : > { %v1288_v9 = vmul.f32 0.6931472, %v1945_v62  ;;  %v1947_v8 = vpop.eup %1946  ;;  %v1388_v42 = vsel %vm236_vm14, %v1339_v29, 0.0 }
 0x2ff   : > { %v1949_v15 = vpop.eup %1948  ;;  %v1296_v2 = vmul.f32 0.6931472, %v1947_v8  ;;  %1958 = vlog2.f32 %v1250_v17 }
 0x300   : > { %v1336_v16 = vadd.f32 14.285714, %v1288_v9  ;;  %v1951_v21 = vpop.eup %1950  ;;  %v1298_v28 = vmul.f32 0.6931472, %v1949_v15  ;;  %1960 = vlog2.f32 %v1251_v24 }
 0x301   : > { %v1090_v20 = vpop.xlane.xlu2 %1089  ;;  %v1953_v31 = vpop.eup %1952  ;;  %v1300_v34 = vmul.f32 0.6931472, %v1951_v21  ;;  %v1340_v36 = vadd.f32 14.285714, %v1296_v2 }
 0x302   : > { %v1126_v0 = vadd.f32 %v1090_v20, %v806_v11  ;;  %v1382_v35 = vsel %vm236_vm14, %v1336_v16, 0.0  ;;  %v1955_v37 = vpop.eup %1954  ;;  %v1302_v7 = vmul.f32 0.6931472, %v1953_v31  ;;  %v1341_v41 = vadd.f32 14.285714, %v1298_v28 }
 0x303   : > { %v1220_v22 = vld [vmem:[#allocation2 + $0xd8] sm:$0xff]  ;;  %v1383_v25 = vadd.f32 %v1382_v35, %v1381_v30  ;;  %v1957_v23 = vpop.eup %1956  ;;  %v1304_v46 = vmul.f32 0.6931472, %v1955_v37  ;;  %v1342_v47 = vadd.f32 14.285714, %v1300_v34  ;;  %v1390_v48 = vsel %vm236_vm14, %v1340_v36, 0.0 }
 0x304   : > { %1159 = vst.msk [vmem:[#allocation2 + $0xe8] sm:$0xff] %vm236_vm14, %v1126_v0  ;;  %v1252_v32 = vmax.f32 %v1220_v22, 1e-30  ;;  %v1223_v40 = vld [vmem:[#allocation2 + $0xf0] sm:$0xff]  ;;  %v1306_v52 = vmul.f32 0.6931472, %v1957_v23 }
 0x305   : > { %v1385_v33 = vadd.f32 %v1384_v26, %v1383_v25  ;;  %v1959_v54 = vpop.eup %1958  ;;  %v1255_v51 = vmax.f32 %v1223_v40, 1e-30  ;;  %v1343_v56 = vadd.f32 14.285714, %v1302_v7  ;;  %v1392_v57 = vsel %vm236_vm14, %v1341_v41, 0.0  ;;  %v1178_v41 = vpop.xlane.xlu1 %1177 }
 0x306   : > { %1962 = vlog2.f32 %v1252_v32  ;;  %v1961_v58 = vpop.eup %1960  ;;  %v1308_v50 = vmul.f32 0.6931472, %v1959_v54  ;;  %v1344_v61 = vadd.f32 14.285714, %v1304_v46  ;;  %v1394_v62 = vsel %vm236_vm14, %v1342_v47, 0.0 }
 0x307   : > { %v1387_v39 = vadd.f32 %v1386_v6, %v1385_v33  ;;  %1964 = vlog2.f32 %v1253_v18  ;;  %v1345_v1 = vadd.f32 14.285714, %v1306_v52  ;;  %v1310_v4 = vmul.f32 0.6931472, %v1961_v58 }
 0x308   : > { %v1396_v5 = vsel %vm236_vm14, %v1343_v56, 0.0  ;;  %v1346_v12 = vadd.f32 14.285714, %v1308_v50  ;;  %v1398_v44 = vsel %vm236_vm14, %v1344_v61, 0.0 }
 0x309   : > { %v1096_v10 = vpop.xlane.xlu2 %1095  ;;  %v1389_v43 = vadd.f32 %v1388_v42, %v1387_v39  ;;  %v1400_v14 = vsel %vm236_vm14, %v1345_v1, 0.0  ;;  %v1347_v19 = vadd.f32 14.285714, %v1310_v4  ;;  %v1179_v42 = vrot.slane %v1178_v41, 4 }
 0x30a   : > { %v1128_v45 = vadd.f32 %v1096_v10, %v808_v38  ;;  %v1402_v21 = vsel %vm236_vm14, %v1346_v12, 0.0 }
 0x30b   : > { %v1222_v59 = vld [vmem:[#allocation2 + $0xe8] sm:$0xff]  ;;  %v1391_v53 = vadd.f32 %v1390_v48, %v1389_v43  ;;  %v1404_v26 = vsel %vm236_vm14, %v1347_v19, 0.0  ;;  %v1180_v10 = vadd.f32 %v1179_v42, %v1178_v41  ;;  %v1166_v48 = vld [vmem:[#allocation3] sm:$0x1] }
 0x30c   : > { %1161 = vst.msk [vmem:[#allocation2 + $0xf8] sm:$0xff] %vm236_vm14, %v1128_v45  ;;  %v1254_v55 = vmax.f32 %v1222_v59, 1e-30  ;;  %v1963_v63 = vpop.eup %1962 }
 0x30d   : > { %v1393_v49 = vadd.f32 %v1392_v57, %v1391_v53  ;;  %v1965_v9 = vpop.eup %1964  ;;  %v1312_v11 = vmul.f32 0.6931472, %v1963_v63  ;;  %v1181_v43 = vrot.slane %v1180_v10, 2 }
 0x30e   : > { %1966 = vlog2.f32 %v1254_v55  ;;  %v1314_v17 = vmul.f32 0.6931472, %v1965_v9 }
 0x30f   : > { %1968 = vlog2.f32 %v1255_v51  ;;  %v1395_v3 = vadd.f32 %v1394_v62, %v1393_v49  ;;  %v1348_v35 = vadd.f32 14.285714, %v1312_v11  ;;  %v1182_v45 = vadd.f32 %v1181_v43, %v1180_v10 }
 0x310   : > { %v1349_v25 = vadd.f32 14.285714, %v1314_v17 }
 0x311   : > { %v1397_v8 = vadd.f32 %v1396_v5, %v1395_v3  ;;  %v1406_v29 = vsel %vm236_vm14, %v1348_v35, 0.0  ;;  %v1183_v46 = vrot.slane %v1182_v45, 1 }
 0x312   : > { %v1408_v34 = vsel %vm236_vm14, %v1349_v25, 0.0 }
 0x313   : > { %v1224_v13 = vld [vmem:[#allocation2 + $0xf8] sm:$0xff]  ;;  %v1399_v16 = vadd.f32 %v1398_v44, %v1397_v8  ;;  %v1184_v47 = vadd.f32 %v1183_v46, %v1182_v45 }
 0x314   : > { %v1967_v15 = vpop.eup %1966  ;;  %v1256_v20 = vmax.f32 %v1224_v13, 1e-30 }
 0x315   : > { %v1969_v30 = vpop.eup %1968  ;;  %v1401_v0 = vadd.f32 %v1400_v14, %v1399_v16  ;;  %v1316_v2 = vmul.f32 0.6931472, %v1967_v15  ;;  %1700 = vpush %v1184_v47 }
 0x316   : > { %1970 = vlog2.f32 %v1256_v20  ;;  %v1318_v24 = vmul.f32 0.6931472, %v1969_v30 }
 0x317   : > { %v1403_v22 = vadd.f32 %v1402_v21, %v1401_v0  ;;  %v1350_v28 = vadd.f32 14.285714, %v1316_v2 }
 0x318   : > { %v1351_v33 = vadd.f32 14.285714, %v1318_v24 }
 0x319   : > { %v1405_v27 = vadd.f32 %v1404_v26, %v1403_v22  ;;  %v1410_v37 = vsel %vm236_vm14, %v1350_v28, 0.0 }
 0x31a   : > { %v1412_v39 = vsel %vm236_vm14, %v1351_v33, 0.0 }
 0x31b   : > { %v1407_v31 = vadd.f32 %v1406_v29, %v1405_v27 }
 0x31c   : > { %v1971_v32 = vpop.eup %1970 }
 0x31d   : > { %v1320_v36 = vmul.f32 0.6931472, %v1971_v32  ;;  %v1409_v6 = vadd.f32 %v1408_v34, %v1407_v31 }
 0x31f   : > { %v1352_v38 = vadd.f32 14.285714, %v1320_v36  ;;  %v1411_v18 = vadd.f32 %v1410_v37, %v1409_v6 }
 0x321   : > { %v1413_v23 = vadd.f32 %v1412_v39, %v1411_v18  ;;  %v1414_v40 = vsel %vm236_vm14, %v1352_v38, 0.0 }
 0x323   : > { %v1415_v7 = vadd.f32 %v1414_v40, %v1413_v23 }
 0x325   : > { %1416 = vadd.xlane.f32.xlu2 %v1415_v7 }
 0x346   : > { %s1701_s21 = spop %1700 }
 0x347   : > { %v1186_v54 = vstv %s1701_s21 }
 0x348   : > { %v1187_v59 = vadd.f32 %v1186_v54, %v1166_v48 }
 0x34a   : > { %1189 = vst.msk [vmem:[#allocation3] sm:$0x1] %vm269_vm15, %v1187_v59 }
 0x351   : > { %v1425_v58 = vld [vmem:[#allocation3] sm:$0x1] }
 0x398   : > { %v1417_v51 = vpop.xlane.xlu2 %1416 }
 0x399   : > { %v1418_v52 = vrot.slane %v1417_v51, 4 }
 0x39b   : > { %v1419_v60 = vadd.f32 %v1418_v52, %v1417_v51 }
 0x39d   : > { %v1420_v53 = vrot.slane %v1419_v60, 2 }
 0x39f   : > { %v1421_v55 = vadd.f32 %v1420_v53, %v1419_v60 }
 0x3a1   : > { %v1422_v56 = vrot.slane %v1421_v55, 1 }
 0x3a3   : > { %v1423_v57 = vadd.f32 %v1422_v56, %v1421_v55 }
 0x3a5   : > { %1702 = vpush %v1423_v57 }
 0x3a6   : > { %1704 = vpush %v1425_v58 }
 0x3d6   : > { %s1703_s8 = spop %1702 }
 0x3d7   : > { %s1705_s16 = spop %1704 }
 0x3d8   : > { %s1427_s18 = ssub.f32 %s1703_s8, %s1705_s16 }
 0x3da   : > { %v1428_v49 = vstv %s1427_s18 }
 0x3db   : > { %1429 = vst [vmem:[%s229_s6] sm:$0x1] %v1428_v49 }
 0x3dc   : > { %2059 = shalt.err (!%p2056_p13)
}
 0x3dd   : > { %1710 = dma.vmem_to_hbm [thread:$0]  (%p2187_p9), %s1443_s7, 16, %s1445_s15, %s1431_s20  }
 0x3de PF: > { %s1456_s19 = sand.u32 1, %s2098_s9   ;;  %p1720_p0 = pnand %p1554_p12, %p2194_p11 }
 0x3df   : > { %s1457_s21 = scalar_lea.sflag [#allocation6], %s1456_s19 }
 0x3e0   : > { %p1721_p1 = pneg %p1720_p0 }
 0x3e2   : > { %2093 = dma.done.wait (%p1721_p1), %s1457_s21, 16  }
 0x3e3   : > { %2095 = vsyncadd (%p1721_p1), %s1457_s21, 4294967280  ;;  %s21_s14 = sadd.s32 1, %s2118_s14   ;;  %s2560_s9 = smov %s2102_s10 }
 0x3e4   : > { %p18_p2 = scmp.ge.s32.totalorder %s21_s14, 4   ;;  %s2561_s10 = smov %s2106_s11 }
 0x3e5   : > { %s2562_s11 = smov %s2192_s23  ;;  %s2563_s12 = smov %s2114_s13 }
 0x3e6   : > { %s2564_s13 = smov %s2566_s17  ;;  %20 = sbr.rel (!%p18_p2) target bundleno = 8 (0x8), region = 98 }
 0x3eb   :  { %1462 = vsyncpa [#allocation5], 1 }
 0x3ec   :  { %1464 = vsyncpa [#allocation5 + $0x1], 1 }
 0x3ed   :  { %1465 = vsyncpa [#allocation8], 1 }
 0x3ee   :  { %1467 = vsyncpa [#allocation8 + $0x1], 1 }
 0x3ef   :  { %1468 = vsyncpa [#allocation6], 1 }
 0x3f0   :  { %1470 = vsyncpa [#allocation6 + $0x1], 1 }

</bundles_post_ra>
